<compile_context>
chip_gen: v6e
topology: v6e:2x2x1
jax: 0.10.0
libtpu: 0.0.40
codegen_flags: <defaults>
</compile_context>

<pallas_src>
import functools
import math

import jax
import jax.numpy as jnp
from jax import lax
from jax.experimental import pallas as pl
from jax.experimental.pallas import tpu as pltpu

# Standard FastSpeech config for model_config.fft_conv1d_kernel / _padding.
FFT_CONV1D_KERNEL = (9, 1)
FFT_CONV1D_PADDING = (4, 0)
LN_EPS = 1e-5


def _fft_block_kernel(x_ref,
                      ln1g_ref, ln1b_ref,
                      wqkv_ref, bqkv_ref, wf_ref, bf_ref,
                      ln2g_ref, ln2b_ref,
                      w1_ref, b1_ref, w2_ref, b2_ref,
                      o_ref,
                      yp_ref,
                      *, n_head, d_k, d_v, conv_k, conv_p, compute_dtype):
    bt, seq, d_model = x_ref.shape
    n_rows = bt * seq
    hdk = n_head * d_k
    f32 = jnp.float32

    def mm(a, w):  # weights are already in compute_dtype; f32 accumulation
        return jnp.dot(a.astype(compute_dtype), w, preferred_element_type=f32)

    def bmm(a, b, dims):  # batched dot_general (batch dim 0), f32 accumulation
        return lax.dot_general(a.astype(compute_dtype), b.astype(compute_dtype),
                               dims, preferred_element_type=f32)

    def layer_norm(v, g, b):
        mu = jnp.mean(v, axis=-1, keepdims=True)
        c = v - mu
        var = jnp.mean(c * c, axis=-1, keepdims=True)
        return c * lax.rsqrt(var + LN_EPS) * g + b

    # Flatten the batch tile: every dense op below sees tall (n_rows, feature).
    x = x_ref[...].reshape(n_rows, d_model).astype(f32)

    # ---- ln1 (also the MHA residual) ----
    xn = layer_norm(x, ln1g_ref[...], ln1b_ref[...])

    # ---- multi-head self-attention (q = k = v = xn) ----
    # One lane-dense fused QKV projection; the 1/sqrt(d_k) attention scale is
    # folded into the Q columns / bias in the wrapper (zero in-kernel cost).
    qkv = mm(xn, wqkv_ref[...]) + bqkv_ref[...]          # (n_rows, 2*H*dk + H*dv)

    ctx_heads = []
    for h in range(n_head):          # n_head is tiny (2 for FastSpeech)
        qh = qkv[:, h * d_k:(h + 1) * d_k].reshape(bt, seq, d_k)
        kh = qkv[:, hdk + h * d_k: hdk + (h + 1) * d_k].reshape(bt, seq, d_k)
        vh = qkv[:, 2 * hdk + h * d_v: 2 * hdk + (h + 1) * d_v].reshape(bt, seq, d_v)
        # Scores contract the last axis of both operands -> K never transposed.
        s = bmm(qh, kh, (((2,), (2,)), ((0,), (0,))))    # (bt, seq, seq)
        s = s - jnp.max(s, axis=-1, keepdims=True)
        # TODO(synk): on v6e/v7x the exp / p*recip product can run in bf16 (EUP).
        p = jnp.exp(s)
        p = p * pl.reciprocal(jnp.sum(p, axis=-1, keepdims=True), approx=True)
        ctx = bmm(p, vh, (((2,), (1,)), ((0,), (0,))))   # (bt, seq, d_v)
        ctx_heads.append(ctx.reshape(n_rows, d_v))
    # Single fused output projection over all heads (K = n_head*d_v).
    ctx = jnp.concatenate(ctx_heads, axis=-1) if n_head > 1 else ctx_heads[0]
    attn_out = mm(ctx, wf_ref[...]) + bf_ref[...] + xn   # MHA residual = ln1 output

    # ---- ln2 (also the FFN residual) ----
    y = layer_norm(attn_out, ln2g_ref[...], ln2b_ref[...])

    # ---- position-wise FFN: Conv1d(k=conv_k, pad=conv_p) -> ReLU -> Conv1d(k=1)
    d_hid = w1_ref.shape[2]
    # Stage y once into a zero-padded VMEM scratch slab; every tap then reads a
    # ref window (no value-level slab copies per tap).
    if conv_p > 0:
        yp_ref[pl.ds(0, conv_p), :] = jnp.zeros((conv_p, d_model), f32)
        yp_ref[pl.ds(conv_p + n_rows, conv_p), :] = jnp.zeros((conv_p, d_model), f32)
    yp_ref[pl.ds(conv_p, n_rows), :] = y

    # Per-row time index (d_model wide -> 4x narrower than the old d_inner-wide
    # mask).  Taps that would read across sequence boundaries of the flattened
    # slab are zeroed on the matmul LHS (equivalent to masking the tap output).
    tpos = lax.broadcasted_iota(jnp.int32, (bt, seq, d_model), 1).reshape(
        n_rows, d_model)

    def tap_body(j, acc):
        off = j - conv_p
        valid = jnp.logical_and(tpos + off >= 0, tpos + off < seq)
        lhs = yp_ref[pl.ds(j, n_rows), :] * valid.astype(f32)
        return acc + mm(lhs, w1_ref[j])                  # tall matmul per tap

    acc = lax.fori_loop(0, conv_k, tap_body, jnp.zeros((n_rows, d_hid), f32))
    hid = jnp.maximum(acc + b1_ref[...], 0.0)
    out = mm(hid, w2_ref[...]) + b2_ref[...] + y         # pointwise conv2 + residual

    o_ref[...] = out.reshape(bt, seq, d_model).astype(o_ref.dtype)


def _choose_batch_tile(sz_b, seq_len, target_rows=512, min_grid_steps=2):
    """Smallest batch tile whose flattened rows (tile*seq) reach `target_rows`,
    while keeping at least `min_grid_steps` grid steps so the "parallel" grid
    axis can actually shard across v7x's two TensorCores.

    On v7x (64 MiB VMEM vs 128 MiB on v5e/v6e) pass an explicit smaller
    batch_tile / lower target_rows if weights + activations do not fit.
    """
    divisors = [d for d in range(1, sz_b + 1) if sz_b % d == 0]
    preferred = [d for d in divisors if sz_b // d >= min_grid_steps] or divisors
    for d in preferred:
        if d * seq_len >= target_rows:
            return d
    return preferred[-1]


def fft_block(x, params, *, n_head, d_k, d_v,
              conv_kernel=FFT_CONV1D_KERNEL, conv_padding=FFT_CONV1D_PADDING,
              batch_tile=None, compute_dtype=jnp.bfloat16,
              vmem_limit_bytes=48 * 1024 * 1024):
    """FFTBlock forward. x: (sz_b, seq, d_model) float32; params: torch-layout dict.

    compute_dtype is the matmul-operand precision (weights are cast once here,
    MXU-native bf16 by default); accumulation is always f32.  Pass
    jnp.float32 for tight validation runs.
    """
    sz_b, seq, d_model = x.shape
    assert conv_kernel[1] == 1 and conv_padding[1] == 0, "second conv must be pointwise"
    assert 2 * conv_padding[0] == conv_kernel[0] - 1, "'same'-length first conv expected"
    conv_k, conv_p = int(conv_kernel[0]), int(conv_padding[0])

    bt = batch_tile or _choose_batch_tile(sz_b, seq)
    assert sz_b % bt == 0
    n_rows = bt * seq

    f32 = jnp.float32
    scale = 1.0 / float(d_k) ** 0.5
    # Fused QKV weight, columns ordered [Q heads | K heads | V heads]; the
    # attention scale is folded into the Q columns / bias.
    wqkv = jnp.concatenate([params["w_qs_w"].T * scale,
                            params["w_ks_w"].T,
                            params["w_vs_w"].T], axis=1).astype(compute_dtype)
    bqkv = jnp.concatenate([params["w_qs_b"] * scale,
                            params["w_ks_b"],
                            params["w_vs_b"]]).reshape(1, -1).astype(f32)
    wf = params["fc_w"].T.astype(compute_dtype)            # (H*d_v, d_model)
    bf = params["fc_b"].reshape(1, d_model).astype(f32)
    ln1g = params["ln1_g"].reshape(1, d_model).astype(f32)
    ln1b = params["ln1_b"].reshape(1, d_model).astype(f32)
    ln2g = params["ln2_g"].reshape(1, d_model).astype(f32)
    ln2b = params["ln2_b"].reshape(1, d_model).astype(f32)
    w1 = params["conv1_w"].transpose(2, 1, 0).astype(compute_dtype)  # (K1, d_model, d_inner)
    b1 = params["conv1_b"].reshape(1, -1).astype(f32)
    w2 = params["conv2_w"][:, :, 0].T.astype(compute_dtype)          # (d_inner, d_model)
    b2 = params["conv2_b"].reshape(1, d_model).astype(f32)

    consts = [ln1g, ln1b, wqkv, bqkv, wf, bf, ln2g, ln2b, w1, b1, w2, b2]

    kernel = functools.partial(
        _fft_block_kernel, n_head=n_head, d_k=d_k, d_v=d_v,
        conv_k=conv_k, conv_p=conv_p, compute_dtype=compute_dtype)

    def _const_spec(a, single_buffer):
        nd = a.ndim
        # Block index never changes across grid steps -> a single VMEM copy
        # (Buffered(1)) instead of the default double buffer halves weight VMEM.
        kwargs = {"pipeline_mode": pl.Buffered(1)} if single_buffer else {}
        return pl.BlockSpec(a.shape, lambda b, _nd=nd: (0,) * _nd, **kwargs)

    def _call(single_buffer_weights):
        return pl.pallas_call(
            kernel,
            out_shape=jax.ShapeDtypeStruct((sz_b, seq, d_model), x.dtype),
            grid_spec=pltpu.PrefetchScalarGridSpec(
                num_scalar_prefetch=0,
                grid=(sz_b // bt,),
                in_specs=[pl.BlockSpec((bt, seq, d_model), lambda b: (b, 0, 0))]
                         + [_const_spec(a, single_buffer_weights) for a in consts],
                out_specs=pl.BlockSpec((bt, seq, d_model), lambda b: (b, 0, 0)),
                scratch_shapes=[
                    # zero-padded slab for the temporal conv taps
                    pltpu.VMEM((n_rows + 2 * conv_p, d_model), f32)],
            ),
            compiler_params=pltpu.CompilerParams(
                dimension_semantics=("parallel",),
                vmem_limit_bytes=vmem_limit_bytes),
        )(x, *consts)

    try:
        return _call(single_buffer_weights=True)
    except Exception:
        # Fallback for jax versions without BlockSpec pipeline_mode / Buffered(1):
        # identical math, weights just double-buffered.
        return _call(single_buffer_weights=False)


# ----------------------------- pure-JAX reference -----------------------------

def _layer_norm_ref(v, g, b):
    mu = v.mean(-1, keepdims=True)
    var = ((v - mu) ** 2).mean(-1, keepdims=True)
    return (v - mu) / jnp.sqrt(var + LN_EPS) * g + b


def _mha_ref(q, k, v, p, *, n_head, d_k, d_v):
    sz_b, len_q, _ = q.shape
    _, len_k, _ = k.shape
    residual = q
    Q = q @ p["w_qs_w"].T + p["w_qs_b"]
    K = k @ p["w_ks_w"].T + p["w_ks_b"]
    V = v @ p["w_vs_w"].T + p["w_vs_b"]
    Q = Q.reshape(sz_b, len_q, n_head, d_k).transpose(2, 0, 1, 3).reshape(-1, len_q, d_k)
    K = K.reshape(sz_b, len_k, n_head, d_k).transpose(2, 0, 1, 3).reshape(-1, len_k, d_k)
    V = V.reshape(sz_b, len_k, n_head, d_v).transpose(2, 0, 1, 3).reshape(-1, len_k, d_v)
    attn = jnp.einsum("bqd,bkd->bqk", Q, K) / (d_k ** 0.5)
    attn = jax.nn.softmax(attn, axis=2)
    out = jnp.einsum("bqk,bkd->bqd", attn, V)
    out = out.reshape(n_head, sz_b, len_q, d_v).transpose(1, 2, 0, 3).reshape(sz_b, len_q, -1)
    out = out @ p["fc_w"].T + p["fc_b"]
    return out + residual


def _ffn_ref(x, p, *, kernel, padding):
    residual = x
    h = jnp.transpose(x, (0, 2, 1))
    h = lax.conv_general_dilated(h, p["conv1_w"], (1,), [(padding[0], padding[0])],
                                 dimension_numbers=("NCH", "OIH", "NCH"))
    h = h + p["conv1_b"][None, :, None]
    h = jnp.maximum(h, 0.0)
    h = lax.conv_general_dilated(h, p["conv2_w"], (1,), [(padding[1], padding[1])],
                                 dimension_numbers=("NCH", "OIH", "NCH"))
    h = h + p["conv2_b"][None, :, None]
    return jnp.transpose(h, (0, 2, 1)) + residual


def _fft_block_ref(x, p, *, n_head, d_k, d_v, kernel, padding):
    xn = _layer_norm_ref(x, p["ln1_g"], p["ln1_b"])
    a = _mha_ref(xn, xn, xn, p, n_head=n_head, d_k=d_k, d_v=d_v)
    an = _layer_norm_ref(a, p["ln2_g"], p["ln2_b"])
    return _ffn_ref(an, p, kernel=kernel, padding=padding)


def _xavier_uniform(key, out_f, in_f):
    bound = math.sqrt(6.0 / (in_f + out_f))
    return jax.random.uniform(key, (out_f, in_f), jnp.float32, -bound, bound)


if __name__ == "__main__":
    sz_b, seq, d_model, d_inner = 2, 8, 32, 64
    n_head, d_k, d_v = 2, 16, 16
    K1, K2 = FFT_CONV1D_KERNEL

    root = jax.random.PRNGKey(0)
    (kx, kwq, kwk, kwv, kwf, kc1, kc2, kcb1, kcb2,
     kg1, kb1, kg2, kb2) = jax.random.split(root, 13)

    x = jax.random.normal(kx, (sz_b, seq, d_model), jnp.float32)

    # Deterministic parameters (Linear: xavier_uniform weights, zero biases,
    # matching _reset_parameters(); LN affine slightly perturbed to exercise it).
    params = {
        "w_qs_w": _xavier_uniform(kwq, n_head * d_k, d_model),
        "w_qs_b": jnp.zeros((n_head * d_k,), jnp.float32),
        "w_ks_w": _xavier_uniform(kwk, n_head * d_k, d_model),
        "w_ks_b": jnp.zeros((n_head * d_k,), jnp.float32),
        "w_vs_w": _xavier_uniform(kwv, n_head * d_v, d_model),
        "w_vs_b": jnp.zeros((n_head * d_v,), jnp.float32),
        "fc_w": _xavier_uniform(kwf, d_model, n_head * d_v),
        "fc_b": jnp.zeros((d_model,), jnp.float32),
        "ln1_g": 1.0 + 0.1 * jax.random.normal(kg1, (d_model,), jnp.float32),
        "ln1_b": 0.1 * jax.random.normal(kb1, (d_model,), jnp.float32),
        "ln2_g": 1.0 + 0.1 * jax.random.normal(kg2, (d_model,), jnp.float32),
        "ln2_b": 0.1 * jax.random.normal(kb2, (d_model,), jnp.float32),
        "conv1_w": 0.1 * jax.random.normal(kc1, (d_inner, d_model, K1), jnp.float32),
        "conv1_b": 0.1 * jax.random.normal(kcb1, (d_inner,), jnp.float32),
        "conv2_w": 0.1 * jax.random.normal(kc2, (d_model, d_inner, K2), jnp.float32),
        "conv2_b": 0.1 * jax.random.normal(kcb2, (d_model,), jnp.float32),
    }

    ref = _fft_block_ref(x, params, n_head=n_head, d_k=d_k, d_v=d_v,
                         kernel=FFT_CONV1D_KERNEL, padding=FFT_CONV1D_PADDING)

    # 1) f32 compute path: tight check against the pure-JAX reference.
    out_f32 = fft_block(x, params, n_head=n_head, d_k=d_k, d_v=d_v,
                        compute_dtype=jnp.float32)
    out_f32 = jax.block_until_ready(out_f32)
    assert out_f32.shape == (sz_b, seq, d_model)
    assert jnp.allclose(out_f32, ref, atol=2e-3, rtol=2e-3), (
        "f32 mismatch vs reference: max abs err = %g"
        % float(jnp.max(jnp.abs(out_f32 - ref))))

    # 2) default bf16 compute path (MXU-native weights/operands, f32 accumulation):
    #    looser tolerance expected from bf16 operand rounding.
    out_bf16 = jax.block_until_ready(
        fft_block(x, params, n_head=n_head, d_k=d_k, d_v=d_v))
    assert jnp.allclose(out_bf16, ref, atol=2.5e-1, rtol=1e-1), (
        "bf16 mismatch vs reference: max abs err = %g"
        % float(jnp.max(jnp.abs(out_bf16 - ref))))

    print("KERNEL_OK")
</pallas_src>

<mosaic_0001>
module attributes {stable_mosaic.version = 11 : i64} {
  func.func @_fft_block_kernel(%arg0: i32, %arg1: memref<1x8x32xf32, #tpu.memory_space<vmem>>, %arg2: memref<1x32xf32, #tpu.memory_space<vmem>>, %arg3: memref<1x32xf32, #tpu.memory_space<vmem>>, %arg4: memref<32x96xf32, #tpu.memory_space<vmem>>, %arg5: memref<1x96xf32, #tpu.memory_space<vmem>>, %arg6: memref<32x32xf32, #tpu.memory_space<vmem>>, %arg7: memref<1x32xf32, #tpu.memory_space<vmem>>, %arg8: memref<1x32xf32, #tpu.memory_space<vmem>>, %arg9: memref<1x32xf32, #tpu.memory_space<vmem>>, %arg10: memref<9x32x64xf32, #tpu.memory_space<vmem>>, %arg11: memref<1x64xf32, #tpu.memory_space<vmem>>, %arg12: memref<64x32xf32, #tpu.memory_space<vmem>>, %arg13: memref<1x32xf32, #tpu.memory_space<vmem>>, %arg14: memref<1x8x32xf32, #tpu.memory_space<vmem>>, %arg15: memref<16x32xf32, #tpu.memory_space<vmem>>) attributes {dimension_semantics = [#tpu.dimension_semantics<parallel>], iteration_bounds = array<i64: 2>, scalar_prefetch = 0 : i64, scratch_operands = 1 : i64, tpu.core_type = #tpu.core_type<tc>, window_params = [{transform_indices = @transform_0, window_bounds = array<i64: 1, 8, 32>}, {pipeline_mode = #tpu.pipeline_mode<synchronous>, transform_indices = @transform_1, window_bounds = array<i64: 1, 32>}, {pipeline_mode = #tpu.pipeline_mode<synchronous>, transform_indices = @transform_2, window_bounds = array<i64: 1, 32>}, {pipeline_mode = #tpu.pipeline_mode<synchronous>, transform_indices = @transform_3, window_bounds = array<i64: 32, 96>}, {pipeline_mode = #tpu.pipeline_mode<synchronous>, transform_indices = @transform_4, window_bounds = array<i64: 1, 96>}, {pipeline_mode = #tpu.pipeline_mode<synchronous>, transform_indices = @transform_5, window_bounds = array<i64: 32, 32>}, {pipeline_mode = #tpu.pipeline_mode<synchronous>, transform_indices = @transform_6, window_bounds = array<i64: 1, 32>}, {pipeline_mode = #tpu.pipeline_mode<synchronous>, transform_indices = @transform_7, window_bounds = array<i64: 1, 32>}, {pipeline_mode = #tpu.pipeline_mode<synchronous>, transform_indices = @transform_8, window_bounds = array<i64: 1, 32>}, {pipeline_mode = #tpu.pipeline_mode<synchronous>, transform_indices = @transform_9, window_bounds = array<i64: 9, 32, 64>}, {pipeline_mode = #tpu.pipeline_mode<synchronous>, transform_indices = @transform_10, window_bounds = array<i64: 1, 64>}, {pipeline_mode = #tpu.pipeline_mode<synchronous>, transform_indices = @transform_11, window_bounds = array<i64: 64, 32>}, {pipeline_mode = #tpu.pipeline_mode<synchronous>, transform_indices = @transform_12, window_bounds = array<i64: 1, 32>}, {transform_indices = @transform_13, window_bounds = array<i64: 1, 8, 32>}]} {
    %c0 = arith.constant 0 : index
    %c0_0 = arith.constant 0 : index
    %c0_1 = arith.constant 0 : index
    %0 = vector.load %arg1[%c0, %c0_0, %c0_1] : memref<1x8x32xf32, #tpu.memory_space<vmem>>, vector<1x8x32xf32>
    %1 = vector.shape_cast %0 : vector<1x8x32xf32> to vector<8x32xf32>
    %c0_2 = arith.constant 0 : index
    %c0_3 = arith.constant 0 : index
    %2 = vector.load %arg2[%c0_2, %c0_3] : memref<1x32xf32, #tpu.memory_space<vmem>>, vector<1x32xf32>
    %c0_4 = arith.constant 0 : index
    %c0_5 = arith.constant 0 : index
    %3 = vector.load %arg3[%c0_4, %c0_5] : memref<1x32xf32, #tpu.memory_space<vmem>>, vector<1x32xf32>
    %cst = arith.constant dense<0.000000e+00> : vector<8xf32>
    %4 = vector.multi_reduction <add>, %1, %cst [1] : vector<8x32xf32> to vector<8xf32>
    %5 = vector.shape_cast %4 : vector<8xf32> to vector<8x1xf32>
    %cst_6 = arith.constant 3.200000e+01 : f32
    %6 = vector.broadcast %cst_6 : f32 to vector<8x1xf32>
    %7 = arith.divf %5, %6 : vector<8x1xf32>
    %8 = vector.broadcast %7 : vector<8x1xf32> to vector<8x32xf32>
    %9 = arith.subf %1, %8 : vector<8x32xf32>
    %10 = arith.mulf %9, %9 : vector<8x32xf32>
    %cst_7 = arith.constant dense<0.000000e+00> : vector<8xf32>
    %11 = vector.multi_reduction <add>, %10, %cst_7 [1] : vector<8x32xf32> to vector<8xf32>
    %12 = vector.shape_cast %11 : vector<8xf32> to vector<8x1xf32>
    %cst_8 = arith.constant 3.200000e+01 : f32
    %13 = vector.broadcast %cst_8 : f32 to vector<8x1xf32>
    %14 = arith.divf %12, %13 : vector<8x1xf32>
    %cst_9 = arith.constant 9.99999974E-6 : f32
    %15 = vector.broadcast %cst_9 : f32 to vector<8x1xf32>
    %16 = arith.addf %14, %15 : vector<8x1xf32>
    %17 = math.rsqrt %16 : vector<8x1xf32>
    %18 = vector.broadcast %17 : vector<8x1xf32> to vector<8x32xf32>
    %19 = arith.mulf %9, %18 : vector<8x32xf32>
    %20 = vector.broadcast %2 : vector<1x32xf32> to vector<8x32xf32>
    %21 = arith.mulf %19, %20 : vector<8x32xf32>
    %22 = vector.broadcast %3 : vector<1x32xf32> to vector<8x32xf32>
    %23 = arith.addf %21, %22 : vector<8x32xf32>
    %c0_10 = arith.constant 0 : index
    %c0_11 = arith.constant 0 : index
    %24 = vector.load %arg4[%c0_10, %c0_11] : memref<32x96xf32, #tpu.memory_space<vmem>>, vector<32x96xf32>
    %cst_12 = arith.constant dense<0.000000e+00> : vector<8x96xf32>
    %25 = tpu.matmul %23, %24, %cst_12 {dimension_numbers = #tpu.dot_dimension_numbers<[1], [0], [0], [1], [0, 0, 1, 1], [], []>} : vector<8x32xf32>, vector<32x96xf32>, vector<8x96xf32> -> vector<8x96xf32>
    %c0_13 = arith.constant 0 : index
    %c0_14 = arith.constant 0 : index
    %26 = vector.load %arg5[%c0_13, %c0_14] : memref<1x96xf32, #tpu.memory_space<vmem>>, vector<1x96xf32>
    %27 = vector.broadcast %26 : vector<1x96xf32> to vector<8x96xf32>
    %28 = arith.addf %25, %27 : vector<8x96xf32>
    %29 = vector.extract_strided_slice %28 {offsets = [0, 0], sizes = [8, 16], strides = [1, 1]} : vector<8x96xf32> to vector<8x16xf32>
    %30 = vector.shape_cast %29 : vector<8x16xf32> to vector<1x8x16xf32>
    %31 = vector.extract_strided_slice %28 {offsets = [0, 32], sizes = [8, 16], strides = [1, 1]} : vector<8x96xf32> to vector<8x16xf32>
    %32 = vector.shape_cast %31 : vector<8x16xf32> to vector<1x8x16xf32>
    %33 = vector.extract_strided_slice %28 {offsets = [0, 64], sizes = [8, 16], strides = [1, 1]} : vector<8x96xf32> to vector<8x16xf32>
    %34 = vector.shape_cast %33 : vector<8x16xf32> to vector<1x8x16xf32>
    %cst_15 = arith.constant dense<0.000000e+00> : vector<1x8x8xf32>
    %35 = tpu.matmul %30, %32, %cst_15 {dimension_numbers = #tpu.dot_dimension_numbers<[2], [2], [1], [1], [0, 0, 0, 1, 1, 1], [0], [0]>} : vector<1x8x16xf32>, vector<1x8x16xf32>, vector<1x8x8xf32> -> vector<1x8x8xf32>
    %cst_16 = arith.constant dense<0xFF800000> : vector<1x8xf32>
    %36 = vector.multi_reduction <maximumf>, %35, %cst_16 [2] : vector<1x8x8xf32> to vector<1x8xf32>
    %37 = vector.shape_cast %36 : vector<1x8xf32> to vector<1x8x1xf32>
    %38 = vector.broadcast %37 : vector<1x8x1xf32> to vector<1x8x8xf32>
    %39 = arith.subf %35, %38 : vector<1x8x8xf32>
    %40 = math.exp %39 : vector<1x8x8xf32>
    %cst_17 = arith.constant dense<0.000000e+00> : vector<1x8xf32>
    %41 = vector.multi_reduction <add>, %40, %cst_17 [2] : vector<1x8x8xf32> to vector<1x8xf32>
    %42 = vector.shape_cast %41 : vector<1x8xf32> to vector<1x8x1xf32>
    %43 = tpu.reciprocal %42 {approx = true} : vector<1x8x1xf32> -> vector<1x8x1xf32>
    %44 = vector.broadcast %43 : vector<1x8x1xf32> to vector<1x8x8xf32>
    %45 = arith.mulf %40, %44 : vector<1x8x8xf32>
    %cst_18 = arith.constant dense<0.000000e+00> : vector<1x8x16xf32>
    %46 = tpu.matmul %45, %34, %cst_18 {dimension_numbers = #tpu.dot_dimension_numbers<[2], [1], [1], [2], [0, 0, 0, 1, 1, 2], [0], [0]>} : vector<1x8x8xf32>, vector<1x8x16xf32>, vector<1x8x16xf32> -> vector<1x8x16xf32>
    %47 = vector.shape_cast %46 : vector<1x8x16xf32> to vector<8x16xf32>
    %48 = vector.extract_strided_slice %28 {offsets = [0, 16], sizes = [8, 16], strides = [1, 1]} : vector<8x96xf32> to vector<8x16xf32>
    %49 = vector.shape_cast %48 : vector<8x16xf32> to vector<1x8x16xf32>
    %50 = vector.extract_strided_slice %28 {offsets = [0, 48], sizes = [8, 16], strides = [1, 1]} : vector<8x96xf32> to vector<8x16xf32>
    %51 = vector.shape_cast %50 : vector<8x16xf32> to vector<1x8x16xf32>
    %52 = vector.extract_strided_slice %28 {offsets = [0, 80], sizes = [8, 16], strides = [1, 1]} : vector<8x96xf32> to vector<8x16xf32>
    %53 = vector.shape_cast %52 : vector<8x16xf32> to vector<1x8x16xf32>
    %cst_19 = arith.constant dense<0.000000e+00> : vector<1x8x8xf32>
    %54 = tpu.matmul %49, %51, %cst_19 {dimension_numbers = #tpu.dot_dimension_numbers<[2], [2], [1], [1], [0, 0, 0, 1, 1, 1], [0], [0]>} : vector<1x8x16xf32>, vector<1x8x16xf32>, vector<1x8x8xf32> -> vector<1x8x8xf32>
    %cst_20 = arith.constant dense<0xFF800000> : vector<1x8xf32>
    %55 = vector.multi_reduction <maximumf>, %54, %cst_20 [2] : vector<1x8x8xf32> to vector<1x8xf32>
    %56 = vector.shape_cast %55 : vector<1x8xf32> to vector<1x8x1xf32>
    %57 = vector.broadcast %56 : vector<1x8x1xf32> to vector<1x8x8xf32>
    %58 = arith.subf %54, %57 : vector<1x8x8xf32>
    %59 = math.exp %58 : vector<1x8x8xf32>
    %cst_21 = arith.constant dense<0.000000e+00> : vector<1x8xf32>
    %60 = vector.multi_reduction <add>, %59, %cst_21 [2] : vector<1x8x8xf32> to vector<1x8xf32>
    %61 = vector.shape_cast %60 : vector<1x8xf32> to vector<1x8x1xf32>
    %62 = tpu.reciprocal %61 {approx = true} : vector<1x8x1xf32> -> vector<1x8x1xf32>
    %63 = vector.broadcast %62 : vector<1x8x1xf32> to vector<1x8x8xf32>
    %64 = arith.mulf %59, %63 : vector<1x8x8xf32>
    %cst_22 = arith.constant dense<0.000000e+00> : vector<1x8x16xf32>
    %65 = tpu.matmul %64, %53, %cst_22 {dimension_numbers = #tpu.dot_dimension_numbers<[2], [1], [1], [2], [0, 0, 0, 1, 1, 2], [0], [0]>} : vector<1x8x8xf32>, vector<1x8x16xf32>, vector<1x8x16xf32> -> vector<1x8x16xf32>
    %66 = vector.shape_cast %65 : vector<1x8x16xf32> to vector<8x16xf32>
    %67 = tpu.concatenate %47, %66 in 1 : vector<8x16xf32>, vector<8x16xf32> -> vector<8x32xf32>
    %c0_23 = arith.constant 0 : index
    %c0_24 = arith.constant 0 : index
    %68 = vector.load %arg6[%c0_23, %c0_24] : memref<32x32xf32, #tpu.memory_space<vmem>>, vector<32x32xf32>
    %cst_25 = arith.constant dense<0.000000e+00> : vector<8x32xf32>
    %69 = tpu.matmul %67, %68, %cst_25 {dimension_numbers = #tpu.dot_dimension_numbers<[1], [0], [0], [1], [0, 0, 1, 1], [], []>} : vector<8x32xf32>, vector<32x32xf32>, vector<8x32xf32> -> vector<8x32xf32>
    %c0_26 = arith.constant 0 : index
    %c0_27 = arith.constant 0 : index
    %70 = vector.load %arg7[%c0_26, %c0_27] : memref<1x32xf32, #tpu.memory_space<vmem>>, vector<1x32xf32>
    %71 = vector.broadcast %70 : vector<1x32xf32> to vector<8x32xf32>
    %72 = arith.addf %69, %71 : vector<8x32xf32>
    %73 = arith.addf %72, %23 : vector<8x32xf32>
    %c0_28 = arith.constant 0 : index
    %c0_29 = arith.constant 0 : index
    %74 = vector.load %arg8[%c0_28, %c0_29] : memref<1x32xf32, #tpu.memory_space<vmem>>, vector<1x32xf32>
    %c0_30 = arith.constant 0 : index
    %c0_31 = arith.constant 0 : index
    %75 = vector.load %arg9[%c0_30, %c0_31] : memref<1x32xf32, #tpu.memory_space<vmem>>, vector<1x32xf32>
    %cst_32 = arith.constant dense<0.000000e+00> : vector<8xf32>
    %76 = vector.multi_reduction <add>, %73, %cst_32 [1] : vector<8x32xf32> to vector<8xf32>
    %77 = vector.shape_cast %76 : vector<8xf32> to vector<8x1xf32>
    %cst_33 = arith.constant 3.200000e+01 : f32
    %78 = vector.broadcast %cst_33 : f32 to vector<8x1xf32>
    %79 = arith.divf %77, %78 : vector<8x1xf32>
    %80 = vector.broadcast %79 : vector<8x1xf32> to vector<8x32xf32>
    %81 = arith.subf %73, %80 : vector<8x32xf32>
    %82 = arith.mulf %81, %81 : vector<8x32xf32>
    %cst_34 = arith.constant dense<0.000000e+00> : vector<8xf32>
    %83 = vector.multi_reduction <add>, %82, %cst_34 [1] : vector<8x32xf32> to vector<8xf32>
    %84 = vector.shape_cast %83 : vector<8xf32> to vector<8x1xf32>
    %cst_35 = arith.constant 3.200000e+01 : f32
    %85 = vector.broadcast %cst_35 : f32 to vector<8x1xf32>
    %86 = arith.divf %84, %85 : vector<8x1xf32>
    %cst_36 = arith.constant 9.99999974E-6 : f32
    %87 = vector.broadcast %cst_36 : f32 to vector<8x1xf32>
    %88 = arith.addf %86, %87 : vector<8x1xf32>
    %89 = math.rsqrt %88 : vector<8x1xf32>
    %90 = vector.broadcast %89 : vector<8x1xf32> to vector<8x32xf32>
    %91 = arith.mulf %81, %90 : vector<8x32xf32>
    %92 = vector.broadcast %74 : vector<1x32xf32> to vector<8x32xf32>
    %93 = arith.mulf %91, %92 : vector<8x32xf32>
    %94 = vector.broadcast %75 : vector<1x32xf32> to vector<8x32xf32>
    %95 = arith.addf %93, %94 : vector<8x32xf32>
    %cst_37 = arith.constant 0.000000e+00 : f32
    %96 = vector.broadcast %cst_37 : f32 to vector<4x32xf32>
    %c0_38 = arith.constant 0 : index
    %c0_39 = arith.constant 0 : index
    %97 = vector.load %arg15[%c0_38, %c0_39] : memref<16x32xf32, #tpu.memory_space<vmem>>, vector<4x32xf32>
    tpu.vector_store %arg15[%c0_38, %c0_39], %96 {strides = array<i32>} : memref<16x32xf32, #tpu.memory_space<vmem>>, vector<4x32xf32>,
    %cst_40 = arith.constant 0.000000e+00 : f32
    %98 = vector.broadcast %cst_40 : f32 to vector<4x32xf32>
    %c12 = arith.constant 12 : index
    %c0_41 = arith.constant 0 : index
    %99 = vector.load %arg15[%c12, %c0_41] : memref<16x32xf32, #tpu.memory_space<vmem>>, vector<4x32xf32>
    tpu.vector_store %arg15[%c12, %c0_41], %98 {strides = array<i32>} : memref<16x32xf32, #tpu.memory_space<vmem>>, vector<4x32xf32>,
    %c4 = arith.constant 4 : index
    %c0_42 = arith.constant 0 : index
    %100 = vector.load %arg15[%c4, %c0_42] : memref<16x32xf32, #tpu.memory_space<vmem>>, vector<8x32xf32>
    tpu.vector_store %arg15[%c4, %c0_42], %95 {strides = array<i32>} : memref<16x32xf32, #tpu.memory_space<vmem>>, vector<8x32xf32>,
    %101 = tpu.iota {dimensions = array<i32: 1>} : vector<1x8x32xi32>
    %102 = vector.shape_cast %101 : vector<1x8x32xi32> to vector<8x32xi32>
    %cst_43 = arith.constant 0.000000e+00 : f32
    %103 = vector.broadcast %cst_43 : f32 to vector<8x64xf32>
    %c0_i32 = arith.constant 0 : i32
    %c9_i32 = arith.constant 9 : i32
    %104 = arith.addi %c0_i32, %c9_i32 : i32
    %c1_i32 = arith.constant 1 : i32
    %105 = scf.for %arg16 = %c0_i32 to %104 step %c1_i32 iter_args(%arg17 = %103) -> (vector<8x64xf32>)  : i32 {
      %c4_i32 = arith.constant 4 : i32
      %119 = arith.subi %arg16, %c4_i32 : i32
      %120 = vector.broadcast %119 : i32 to vector<8x32xi32>
      %121 = arith.addi %102, %120 : vector<8x32xi32>
      %c0_i32_56 = arith.constant 0 : i32
      %122 = vector.broadcast %c0_i32_56 : i32 to vector<8x32xi32>
      %123 = arith.cmpi sge, %121, %122 : vector<8x32xi32>
      %124 = vector.broadcast %119 : i32 to vector<8x32xi32>
      %125 = arith.addi %102, %124 : vector<8x32xi32>
      %c8_i32 = arith.constant 8 : i32
      %126 = vector.broadcast %c8_i32 : i32 to vector<8x32xi32>
      %127 = arith.cmpi slt, %125, %126 : vector<8x32xi32>
      %128 = arith.andi %123, %127 : vector<8x32xi1>
      %129 = arith.index_cast %arg16 : i32 to index
      %c0_57 = arith.constant 0 : index
      %130 = vector.load %arg15[%129, %c0_57] : memref<16x32xf32, #tpu.memory_space<vmem>>, vector<8x32xf32>
      %131 = arith.extui %128 : vector<8x32xi1> to vector<8x32xi32>
      %132 = arith.sitofp %131 : vector<8x32xi32> to vector<8x32xf32>
      %133 = arith.mulf %130, %132 : vector<8x32xf32>
      %134 = arith.index_cast %arg16 : i32 to index
      %c0_58 = arith.constant 0 : index
      %c0_59 = arith.constant 0 : index
      %135 = vector.load %arg10[%134, %c0_58, %c0_59] : memref<9x32x64xf32, #tpu.memory_space<vmem>>, vector<1x32x64xf32>
      %136 = vector.shape_cast %135 : vector<1x32x64xf32> to vector<32x64xf32>
      %cst_60 = arith.constant dense<0.000000e+00> : vector<8x64xf32>
      %137 = tpu.matmul %133, %136, %cst_60 {dimension_numbers = #tpu.dot_dimension_numbers<[1], [0], [0], [1], [0, 0, 1, 1], [], []>} : vector<8x32xf32>, vector<32x64xf32>, vector<8x64xf32> -> vector<8x64xf32>
      %138 = arith.addf %arg17, %137 : vector<8x64xf32>
      scf.yield %138 : vector<8x64xf32>
    }
    %c9_i32_44 = arith.constant 9 : i32
    %c0_45 = arith.constant 0 : index
    %c0_46 = arith.constant 0 : index
    %106 = vector.load %arg11[%c0_45, %c0_46] : memref<1x64xf32, #tpu.memory_space<vmem>>, vector<1x64xf32>
    %107 = vector.broadcast %106 : vector<1x64xf32> to vector<8x64xf32>
    %108 = arith.addf %105, %107 : vector<8x64xf32>
    %cst_47 = arith.constant 0.000000e+00 : f32
    %109 = vector.broadcast %cst_47 : f32 to vector<8x64xf32>
    %110 = arith.maximumf %108, %109 : vector<8x64xf32>
    %c0_48 = arith.constant 0 : index
    %c0_49 = arith.constant 0 : index
    %111 = vector.load %arg12[%c0_48, %c0_49] : memref<64x32xf32, #tpu.memory_space<vmem>>, vector<64x32xf32>
    %cst_50 = arith.constant dense<0.000000e+00> : vector<8x32xf32>
    %112 = tpu.matmul %110, %111, %cst_50 {dimension_numbers = #tpu.dot_dimension_numbers<[1], [0], [0], [1], [0, 0, 1, 1], [], []>} : vector<8x64xf32>, vector<64x32xf32>, vector<8x32xf32> -> vector<8x32xf32>
    %c0_51 = arith.constant 0 : index
    %c0_52 = arith.constant 0 : index
    %113 = vector.load %arg13[%c0_51, %c0_52] : memref<1x32xf32, #tpu.memory_space<vmem>>, vector<1x32xf32>
    %114 = vector.broadcast %113 : vector<1x32xf32> to vector<8x32xf32>
    %115 = arith.addf %112, %114 : vector<8x32xf32>
    %116 = arith.addf %115, %95 : vector<8x32xf32>
    %117 = vector.shape_cast %116 : vector<8x32xf32> to vector<1x8x32xf32>
    %c0_53 = arith.constant 0 : index
    %c0_54 = arith.constant 0 : index
    %c0_55 = arith.constant 0 : index
    %118 = vector.load %arg14[%c0_53, %c0_54, %c0_55] : memref<1x8x32xf32, #tpu.memory_space<vmem>>, vector<1x8x32xf32>
    tpu.vector_store %arg14[%c0_53, %c0_54, %c0_55], %117 {strides = array<i32>} : memref<1x8x32xf32, #tpu.memory_space<vmem>>, vector<1x8x32xf32>,
    return
  }
  func.func @transform_0(%arg0: i32) -> (i32, i32, i32) {
    %c0_i32 = arith.constant 0 : i32
    %c0_i32_0 = arith.constant 0 : i32
    %c0_i32_1 = arith.constant 0 : i32
    return %arg0, %c0_i32, %c0_i32_0 : i32, i32, i32
  }
  func.func @transform_1(%arg0: i32) -> (i32, i32) {
    %c0_i32 = arith.constant 0 : i32
    %c0_i32_0 = arith.constant 0 : i32
    %c0_i32_1 = arith.constant 0 : i32
    return %c0_i32, %c0_i32_0 : i32, i32
  }
  func.func @transform_2(%arg0: i32) -> (i32, i32) {
    %c0_i32 = arith.constant 0 : i32
    %c0_i32_0 = arith.constant 0 : i32
    %c0_i32_1 = arith.constant 0 : i32
    return %c0_i32, %c0_i32_0 : i32, i32
  }
  func.func @transform_3(%arg0: i32) -> (i32, i32) {
    %c0_i32 = arith.constant 0 : i32
    %c0_i32_0 = arith.constant 0 : i32
    %c0_i32_1 = arith.constant 0 : i32
    return %c0_i32, %c0_i32_0 : i32, i32
  }
  func.func @transform_4(%arg0: i32) -> (i32, i32) {
    %c0_i32 = arith.constant 0 : i32
    %c0_i32_0 = arith.constant 0 : i32
    %c0_i32_1 = arith.constant 0 : i32
    return %c0_i32, %c0_i32_0 : i32, i32
  }
  func.func @transform_5(%arg0: i32) -> (i32, i32) {
    %c0_i32 = arith.constant 0 : i32
    %c0_i32_0 = arith.constant 0 : i32
    %c0_i32_1 = arith.constant 0 : i32
    return %c0_i32, %c0_i32_0 : i32, i32
  }
  func.func @transform_6(%arg0: i32) -> (i32, i32) {
    %c0_i32 = arith.constant 0 : i32
    %c0_i32_0 = arith.constant 0 : i32
    %c0_i32_1 = arith.constant 0 : i32
    return %c0_i32, %c0_i32_0 : i32, i32
  }
  func.func @transform_7(%arg0: i32) -> (i32, i32) {
    %c0_i32 = arith.constant 0 : i32
    %c0_i32_0 = arith.constant 0 : i32
    %c0_i32_1 = arith.constant 0 : i32
    return %c0_i32, %c0_i32_0 : i32, i32
  }
  func.func @transform_8(%arg0: i32) -> (i32, i32) {
    %c0_i32 = arith.constant 0 : i32
    %c0_i32_0 = arith.constant 0 : i32
    %c0_i32_1 = arith.constant 0 : i32
    return %c0_i32, %c0_i32_0 : i32, i32
  }
  func.func @transform_9(%arg0: i32) -> (i32, i32, i32) {
    %c0_i32 = arith.constant 0 : i32
    %c0_i32_0 = arith.constant 0 : i32
    %c0_i32_1 = arith.constant 0 : i32
    %c0_i32_2 = arith.constant 0 : i32
    return %c0_i32, %c0_i32_0, %c0_i32_1 : i32, i32, i32
  }
  func.func @transform_10(%arg0: i32) -> (i32, i32) {
    %c0_i32 = arith.constant 0 : i32
    %c0_i32_0 = arith.constant 0 : i32
    %c0_i32_1 = arith.constant 0 : i32
    return %c0_i32, %c0_i32_0 : i32, i32
  }
  func.func @transform_11(%arg0: i32) -> (i32, i32) {
    %c0_i32 = arith.constant 0 : i32
    %c0_i32_0 = arith.constant 0 : i32
    %c0_i32_1 = arith.constant 0 : i32
    return %c0_i32, %c0_i32_0 : i32, i32
  }
  func.func @transform_12(%arg0: i32) -> (i32, i32) {
    %c0_i32 = arith.constant 0 : i32
    %c0_i32_0 = arith.constant 0 : i32
    %c0_i32_1 = arith.constant 0 : i32
    return %c0_i32, %c0_i32_0 : i32, i32
  }
  func.func @transform_13(%arg0: i32) -> (i32, i32, i32) {
    %c0_i32 = arith.constant 0 : i32
    %c0_i32_0 = arith.constant 0 : i32
    %c0_i32_1 = arith.constant 0 : i32
    return %arg0, %c0_i32, %c0_i32_0 : i32, i32, i32
  }
}

module attributes {stable_mosaic.version = 11 : i64} {
  func.func @_fft_block_kernel(%arg0: i32, %arg1: memref<1x8x32xf32, #tpu.memory_space<vmem>>, %arg2: memref<1x32xf32, #tpu.memory_space<vmem>>, %arg3: memref<1x32xf32, #tpu.memory_space<vmem>>, %arg4: memref<32x96xf32, #tpu.memory_space<vmem>>, %arg5: memref<1x96xf32, #tpu.memory_space<vmem>>, %arg6: memref<32x32xf32, #tpu.memory_space<vmem>>, %arg7: memref<1x32xf32, #tpu.memory_space<vmem>>, %arg8: memref<1x32xf32, #tpu.memory_space<vmem>>, %arg9: memref<1x32xf32, #tpu.memory_space<vmem>>, %arg10: memref<9x32x64xf32, #tpu.memory_space<vmem>>, %arg11: memref<1x64xf32, #tpu.memory_space<vmem>>, %arg12: memref<64x32xf32, #tpu.memory_space<vmem>>, %arg13: memref<1x32xf32, #tpu.memory_space<vmem>>, %arg14: memref<1x8x32xf32, #tpu.memory_space<vmem>>, %arg15: memref<16x32xf32, #tpu.memory_space<vmem>>) attributes {dimension_semantics = [#tpu.dimension_semantics<parallel>], iteration_bounds = array<i64: 2>, scalar_prefetch = 0 : i64, scratch_operands = 1 : i64, tpu.core_type = #tpu.core_type<tc>, window_params = [{transform_indices = @transform_0, window_bounds = array<i64: 1, 8, 32>}, {pipeline_mode = #tpu.pipeline_mode<synchronous>, transform_indices = @transform_1, window_bounds = array<i64: 1, 32>}, {pipeline_mode = #tpu.pipeline_mode<synchronous>, transform_indices = @transform_2, window_bounds = array<i64: 1, 32>}, {pipeline_mode = #tpu.pipeline_mode<synchronous>, transform_indices = @transform_3, window_bounds = array<i64: 32, 96>}, {pipeline_mode = #tpu.pipeline_mode<synchronous>, transform_indices = @transform_4, window_bounds = array<i64: 1, 96>}, {pipeline_mode = #tpu.pipeline_mode<synchronous>, transform_indices = @transform_5, window_bounds = array<i64: 32, 32>}, {pipeline_mode = #tpu.pipeline_mode<synchronous>, transform_indices = @transform_6, window_bounds = array<i64: 1, 32>}, {pipeline_mode = #tpu.pipeline_mode<synchronous>, transform_indices = @transform_7, window_bounds = array<i64: 1, 32>}, {pipeline_mode = #tpu.pipeline_mode<synchronous>, transform_indices = @transform_8, window_bounds = array<i64: 1, 32>}, {pipeline_mode = #tpu.pipeline_mode<synchronous>, transform_indices = @transform_9, window_bounds = array<i64: 9, 32, 64>}, {pipeline_mode = #tpu.pipeline_mode<synchronous>, transform_indices = @transform_10, window_bounds = array<i64: 1, 64>}, {pipeline_mode = #tpu.pipeline_mode<synchronous>, transform_indices = @transform_11, window_bounds = array<i64: 64, 32>}, {pipeline_mode = #tpu.pipeline_mode<synchronous>, transform_indices = @transform_12, window_bounds = array<i64: 1, 32>}, {transform_indices = @transform_13, window_bounds = array<i64: 1, 8, 32>}]} {
    %c0 = arith.constant 0 : index
    %c0_0 = arith.constant 0 : index
    %c0_1 = arith.constant 0 : index
    %0 = vector.load %arg1[%c0, %c0_0, %c0_1] : memref<1x8x32xf32, #tpu.memory_space<vmem>>, vector<1x8x32xf32>
    %1 = vector.shape_cast %0 : vector<1x8x32xf32> to vector<8x32xf32>
    %c0_2 = arith.constant 0 : index
    %c0_3 = arith.constant 0 : index
    %2 = vector.load %arg2[%c0_2, %c0_3] : memref<1x32xf32, #tpu.memory_space<vmem>>, vector<1x32xf32>
    %c0_4 = arith.constant 0 : index
    %c0_5 = arith.constant 0 : index
    %3 = vector.load %arg3[%c0_4, %c0_5] : memref<1x32xf32, #tpu.memory_space<vmem>>, vector<1x32xf32>
    %cst = arith.constant dense<0.000000e+00> : vector<8xf32>
    %4 = vector.multi_reduction <add>, %1, %cst [1] : vector<8x32xf32> to vector<8xf32>
    %5 = vector.shape_cast %4 : vector<8xf32> to vector<8x1xf32>
    %cst_6 = arith.constant 3.200000e+01 : f32
    %6 = vector.broadcast %cst_6 : f32 to vector<8x1xf32>
    %7 = arith.divf %5, %6 : vector<8x1xf32>
    %8 = vector.broadcast %7 : vector<8x1xf32> to vector<8x32xf32>
    %9 = arith.subf %1, %8 : vector<8x32xf32>
    %10 = arith.mulf %9, %9 : vector<8x32xf32>
    %cst_7 = arith.constant dense<0.000000e+00> : vector<8xf32>
    %11 = vector.multi_reduction <add>, %10, %cst_7 [1] : vector<8x32xf32> to vector<8xf32>
    %12 = vector.shape_cast %11 : vector<8xf32> to vector<8x1xf32>
    %cst_8 = arith.constant 3.200000e+01 : f32
    %13 = vector.broadcast %cst_8 : f32 to vector<8x1xf32>
    %14 = arith.divf %12, %13 : vector<8x1xf32>
    %cst_9 = arith.constant 9.99999974E-6 : f32
    %15 = vector.broadcast %cst_9 : f32 to vector<8x1xf32>
    %16 = arith.addf %14, %15 : vector<8x1xf32>
    %17 = math.rsqrt %16 : vector<8x1xf32>
    %18 = vector.broadcast %17 : vector<8x1xf32> to vector<8x32xf32>
    %19 = arith.mulf %9, %18 : vector<8x32xf32>
    %20 = vector.broadcast %2 : vector<1x32xf32> to vector<8x32xf32>
    %21 = arith.mulf %19, %20 : vector<8x32xf32>
    %22 = vector.broadcast %3 : vector<1x32xf32> to vector<8x32xf32>
    %23 = arith.addf %21, %22 : vector<8x32xf32>
    %c0_10 = arith.constant 0 : index
    %c0_11 = arith.constant 0 : index
    %24 = vector.load %arg4[%c0_10, %c0_11] : memref<32x96xf32, #tpu.memory_space<vmem>>, vector<32x96xf32>
    %cst_12 = arith.constant dense<0.000000e+00> : vector<8x96xf32>
    %25 = tpu.matmul %23, %24, %cst_12 {dimension_numbers = #tpu.dot_dimension_numbers<[1], [0], [0], [1], [0, 0, 1, 1], [], []>} : vector<8x32xf32>, vector<32x96xf32>, vector<8x96xf32> -> vector<8x96xf32>
    %c0_13 = arith.constant 0 : index
    %c0_14 = arith.constant 0 : index
    %26 = vector.load %arg5[%c0_13, %c0_14] : memref<1x96xf32, #tpu.memory_space<vmem>>, vector<1x96xf32>
    %27 = vector.broadcast %26 : vector<1x96xf32> to vector<8x96xf32>
    %28 = arith.addf %25, %27 : vector<8x96xf32>
    %29 = vector.extract_strided_slice %28 {offsets = [0, 0], sizes = [8, 16], strides = [1, 1]} : vector<8x96xf32> to vector<8x16xf32>
    %30 = vector.shape_cast %29 : vector<8x16xf32> to vector<1x8x16xf32>
    %31 = vector.extract_strided_slice %28 {offsets = [0, 32], sizes = [8, 16], strides = [1, 1]} : vector<8x96xf32> to vector<8x16xf32>
    %32 = vector.shape_cast %31 : vector<8x16xf32> to vector<1x8x16xf32>
    %33 = vector.extract_strided_slice %28 {offsets = [0, 64], sizes = [8, 16], strides = [1, 1]} : vector<8x96xf32> to vector<8x16xf32>
    %34 = vector.shape_cast %33 : vector<8x16xf32> to vector<1x8x16xf32>
    %cst_15 = arith.constant dense<0.000000e+00> : vector<1x8x8xf32>
    %35 = tpu.matmul %30, %32, %cst_15 {dimension_numbers = #tpu.dot_dimension_numbers<[2], [2], [1], [1], [0, 0, 0, 1, 1, 1], [0], [0]>} : vector<1x8x16xf32>, vector<1x8x16xf32>, vector<1x8x8xf32> -> vector<1x8x8xf32>
    %cst_16 = arith.constant dense<0xFF800000> : vector<1x8xf32>
    %36 = vector.multi_reduction <maximumf>, %35, %cst_16 [2] : vector<1x8x8xf32> to vector<1x8xf32>
    %37 = vector.shape_cast %36 : vector<1x8xf32> to vector<1x8x1xf32>
    %38 = vector.broadcast %37 : vector<1x8x1xf32> to vector<1x8x8xf32>
    %39 = arith.subf %35, %38 : vector<1x8x8xf32>
    %40 = math.exp %39 : vector<1x8x8xf32>
    %cst_17 = arith.constant dense<0.000000e+00> : vector<1x8xf32>
    %41 = vector.multi_reduction <add>, %40, %cst_17 [2] : vector<1x8x8xf32> to vector<1x8xf32>
    %42 = vector.shape_cast %41 : vector<1x8xf32> to vector<1x8x1xf32>
    %43 = tpu.reciprocal %42 {approx = true} : vector<1x8x1xf32> -> vector<1x8x1xf32>
    %44 = vector.broadcast %43 : vector<1x8x1xf32> to vector<1x8x8xf32>
    %45 = arith.mulf %40, %44 : vector<1x8x8xf32>
    %cst_18 = arith.constant dense<0.000000e+00> : vector<1x8x16xf32>
    %46 = tpu.matmul %45, %34, %cst_18 {dimension_numbers = #tpu.dot_dimension_numbers<[2], [1], [1], [2], [0, 0, 0, 1, 1, 2], [0], [0]>} : vector<1x8x8xf32>, vector<1x8x16xf32>, vector<1x8x16xf32> -> vector<1x8x16xf32>
    %47 = vector.shape_cast %46 : vector<1x8x16xf32> to vector<8x16xf32>
    %48 = vector.extract_strided_slice %28 {offsets = [0, 16], sizes = [8, 16], strides = [1, 1]} : vector<8x96xf32> to vector<8x16xf32>
    %49 = vector.shape_cast %48 : vector<8x16xf32> to vector<1x8x16xf32>
    %50 = vector.extract_strided_slice %28 {offsets = [0, 48], sizes = [8, 16], strides = [1, 1]} : vector<8x96xf32> to vector<8x16xf32>
    %51 = vector.shape_cast %50 : vector<8x16xf32> to vector<1x8x16xf32>
    %52 = vector.extract_strided_slice %28 {offsets = [0, 80], sizes = [8, 16], strides = [1, 1]} : vector<8x96xf32> to vector<8x16xf32>
    %53 = vector.shape_cast %52 : vector<8x16xf32> to vector<1x8x16xf32>
    %cst_19 = arith.constant dense<0.000000e+00> : vector<1x8x8xf32>
    %54 = tpu.matmul %49, %51, %cst_19 {dimension_numbers = #tpu.dot_dimension_numbers<[2], [2], [1], [1], [0, 0, 0, 1, 1, 1], [0], [0]>} : vector<1x8x16xf32>, vector<1x8x16xf32>, vector<1x8x8xf32> -> vector<1x8x8xf32>
    %cst_20 = arith.constant dense<0xFF800000> : vector<1x8xf32>
    %55 = vector.multi_reduction <maximumf>, %54, %cst_20 [2] : vector<1x8x8xf32> to vector<1x8xf32>
    %56 = vector.shape_cast %55 : vector<1x8xf32> to vector<1x8x1xf32>
    %57 = vector.broadcast %56 : vector<1x8x1xf32> to vector<1x8x8xf32>
    %58 = arith.subf %54, %57 : vector<1x8x8xf32>
    %59 = math.exp %58 : vector<1x8x8xf32>
    %cst_21 = arith.constant dense<0.000000e+00> : vector<1x8xf32>
    %60 = vector.multi_reduction <add>, %59, %cst_21 [2] : vector<1x8x8xf32> to vector<1x8xf32>
    %61 = vector.shape_cast %60 : vector<1x8xf32> to vector<1x8x1xf32>
    %62 = tpu.reciprocal %61 {approx = true} : vector<1x8x1xf32> -> vector<1x8x1xf32>
    %63 = vector.broadcast %62 : vector<1x8x1xf32> to vector<1x8x8xf32>
    %64 = arith.mulf %59, %63 : vector<1x8x8xf32>
    %cst_22 = arith.constant dense<0.000000e+00> : vector<1x8x16xf32>
    %65 = tpu.matmul %64, %53, %cst_22 {dimension_numbers = #tpu.dot_dimension_numbers<[2], [1], [1], [2], [0, 0, 0, 1, 1, 2], [0], [0]>} : vector<1x8x8xf32>, vector<1x8x16xf32>, vector<1x8x16xf32> -> vector<1x8x16xf32>
    %66 = vector.shape_cast %65 : vector<1x8x16xf32> to vector<8x16xf32>
    %67 = tpu.concatenate %47, %66 in 1 : vector<8x16xf32>, vector<8x16xf32> -> vector<8x32xf32>
    %c0_23 = arith.constant 0 : index
    %c0_24 = arith.constant 0 : index
    %68 = vector.load %arg6[%c0_23, %c0_24] : memref<32x32xf32, #tpu.memory_space<vmem>>, vector<32x32xf32>
    %cst_25 = arith.constant dense<0.000000e+00> : vector<8x32xf32>
    %69 = tpu.matmul %67, %68, %cst_25 {dimension_numbers = #tpu.dot_dimension_numbers<[1], [0], [0], [1], [0, 0, 1, 1], [], []>} : vector<8x32xf32>, vector<32x32xf32>, vector<8x32xf32> -> vector<8x32xf32>
    %c0_26 = arith.constant 0 : index
    %c0_27 = arith.constant 0 : index
    %70 = vector.load %arg7[%c0_26, %c0_27] : memref<1x32xf32, #tpu.memory_space<vmem>>, vector<1x32xf32>
    %71 = vector.broadcast %70 : vector<1x32xf32> to vector<8x32xf32>
    %72 = arith.addf %69, %71 : vector<8x32xf32>
    %73 = arith.addf %72, %23 : vector<8x32xf32>
    %c0_28 = arith.constant 0 : index
    %c0_29 = arith.constant 0 : index
    %74 = vector.load %arg8[%c0_28, %c0_29] : memref<1x32xf32, #tpu.memory_space<vmem>>, vector<1x32xf32>
    %c0_30 = arith.constant 0 : index
    %c0_31 = arith.constant 0 : index
    %75 = vector.load %arg9[%c0_30, %c0_31] : memref<1x32xf32, #tpu.memory_space<vmem>>, vector<1x32xf32>
    %cst_32 = arith.constant dense<0.000000e+00> : vector<8xf32>
    %76 = vector.multi_reduction <add>, %73, %cst_32 [1] : vector<8x32xf32> to vector<8xf32>
    %77 = vector.shape_cast %76 : vector<8xf32> to vector<8x1xf32>
    %cst_33 = arith.constant 3.200000e+01 : f32
    %78 = vector.broadcast %cst_33 : f32 to vector<8x1xf32>
    %79 = arith.divf %77, %78 : vector<8x1xf32>
    %80 = vector.broadcast %79 : vector<8x1xf32> to vector<8x32xf32>
    %81 = arith.subf %73, %80 : vector<8x32xf32>
    %82 = arith.mulf %81, %81 : vector<8x32xf32>
    %cst_34 = arith.constant dense<0.000000e+00> : vector<8xf32>
    %83 = vector.multi_reduction <add>, %82, %cst_34 [1] : vector<8x32xf32> to vector<8xf32>
    %84 = vector.shape_cast %83 : vector<8xf32> to vector<8x1xf32>
    %cst_35 = arith.constant 3.200000e+01 : f32
    %85 = vector.broadcast %cst_35 : f32 to vector<8x1xf32>
    %86 = arith.divf %84, %85 : vector<8x1xf32>
    %cst_36 = arith.constant 9.99999974E-6 : f32
    %87 = vector.broadcast %cst_36 : f32 to vector<8x1xf32>
    %88 = arith.addf %86, %87 : vector<8x1xf32>
    %89 = math.rsqrt %88 : vector<8x1xf32>
    %90 = vector.broadcast %89 : vector<8x1xf32> to vector<8x32xf32>
    %91 = arith.mulf %81, %90 : vector<8x32xf32>
    %92 = vector.broadcast %74 : vector<1x32xf32> to vector<8x32xf32>
    %93 = arith.mulf %91, %92 : vector<8x32xf32>
    %94 = vector.broadcast %75 : vector<1x32xf32> to vector<8x32xf32>
    %95 = arith.addf %93, %94 : vector<8x32xf32>
    %cst_37 = arith.constant 0.000000e+00 : f32
    %96 = vector.broadcast %cst_37 : f32 to vector<4x32xf32>
    %c0_38 = arith.constant 0 : index
    %c0_39 = arith.constant 0 : index
    %97 = vector.load %arg15[%c0_38, %c0_39] : memref<16x32xf32, #tpu.memory_space<vmem>>, vector<4x32xf32>
    tpu.vector_store %arg15[%c0_38, %c0_39], %96 {strides = array<i32>} : memref<16x32xf32, #tpu.memory_space<vmem>>, vector<4x32xf32>,
    %cst_40 = arith.constant 0.000000e+00 : f32
    %98 = vector.broadcast %cst_40 : f32 to vector<4x32xf32>
    %c12 = arith.constant 12 : index
    %c0_41 = arith.constant 0 : index
    %99 = vector.load %arg15[%c12, %c0_41] : memref<16x32xf32, #tpu.memory_space<vmem>>, vector<4x32xf32>
    tpu.vector_store %arg15[%c12, %c0_41], %98 {strides = array<i32>} : memref<16x32xf32, #tpu.memory_space<vmem>>, vector<4x32xf32>,
    %c4 = arith.constant 4 : index
    %c0_42 = arith.constant 0 : index
    %100 = vector.load %arg15[%c4, %c0_42] : memref<16x32xf32, #tpu.memory_space<vmem>>, vector<8x32xf32>
    tpu.vector_store %arg15[%c4, %c0_42], %95 {strides = array<i32>} : memref<16x32xf32, #tpu.memory_space<vmem>>, vector<8x32xf32>,
    %101 = tpu.iota {dimensions = array<i32: 1>} : vector<1x8x32xi32>
    %102 = vector.shape_cast %101 : vector<1x8x32xi32> to vector<8x32xi32>
    %cst_43 = arith.constant 0.000000e+00 : f32
    %103 = vector.broadcast %cst_43 : f32 to vector<8x64xf32>
    %c0_i32 = arith.constant 0 : i32
    %c9_i32 = arith.constant 9 : i32
    %104 = arith.addi %c0_i32, %c9_i32 : i32
    %c1_i32 = arith.constant 1 : i32
    %105 = scf.for %arg16 = %c0_i32 to %104 step %c1_i32 iter_args(%arg17 = %103) -> (vector<8x64xf32>)  : i32 {
      %c4_i32 = arith.constant 4 : i32
      %119 = arith.subi %arg16, %c4_i32 : i32
      %120 = vector.broadcast %119 : i32 to vector<8x32xi32>
      %121 = arith.addi %102, %120 : vector<8x32xi32>
      %c0_i32_56 = arith.constant 0 : i32
      %122 = vector.broadcast %c0_i32_56 : i32 to vector<8x32xi32>
      %123 = arith.cmpi sge, %121, %122 : vector<8x32xi32>
      %124 = vector.broadcast %119 : i32 to vector<8x32xi32>
      %125 = arith.addi %102, %124 : vector<8x32xi32>
      %c8_i32 = arith.constant 8 : i32
      %126 = vector.broadcast %c8_i32 : i32 to vector<8x32xi32>
      %127 = arith.cmpi slt, %125, %126 : vector<8x32xi32>
      %128 = arith.andi %123, %127 : vector<8x32xi1>
      %129 = arith.index_cast %arg16 : i32 to index
      %c0_57 = arith.constant 0 : index
      %130 = vector.load %arg15[%129, %c0_57] : memref<16x32xf32, #tpu.memory_space<vmem>>, vector<8x32xf32>
      %131 = arith.extui %128 : vector<8x32xi1> to vector<8x32xi32>
      %132 = arith.sitofp %131 : vector<8x32xi32> to vector<8x32xf32>
      %133 = arith.mulf %130, %132 : vector<8x32xf32>
      %134 = arith.index_cast %arg16 : i32 to index
      %c0_58 = arith.constant 0 : index
      %c0_59 = arith.constant 0 : index
      %135 = vector.load %arg10[%134, %c0_58, %c0_59] : memref<9x32x64xf32, #tpu.memory_space<vmem>>, vector<1x32x64xf32>
      %136 = vector.shape_cast %135 : vector<1x32x64xf32> to vector<32x64xf32>
      %cst_60 = arith.constant dense<0.000000e+00> : vector<8x64xf32>
      %137 = tpu.matmul %133, %136, %cst_60 {dimension_numbers = #tpu.dot_dimension_numbers<[1], [0], [0], [1], [0, 0, 1, 1], [], []>} : vector<8x32xf32>, vector<32x64xf32>, vector<8x64xf32> -> vector<8x64xf32>
      %138 = arith.addf %arg17, %137 : vector<8x64xf32>
      scf.yield %138 : vector<8x64xf32>
    }
    %c9_i32_44 = arith.constant 9 : i32
    %c0_45 = arith.constant 0 : index
    %c0_46 = arith.constant 0 : index
    %106 = vector.load %arg11[%c0_45, %c0_46] : memref<1x64xf32, #tpu.memory_space<vmem>>, vector<1x64xf32>
    %107 = vector.broadcast %106 : vector<1x64xf32> to vector<8x64xf32>
    %108 = arith.addf %105, %107 : vector<8x64xf32>
    %cst_47 = arith.constant 0.000000e+00 : f32
    %109 = vector.broadcast %cst_47 : f32 to vector<8x64xf32>
    %110 = arith.maximumf %108, %109 : vector<8x64xf32>
    %c0_48 = arith.constant 0 : index
    %c0_49 = arith.constant 0 : index
    %111 = vector.load %arg12[%c0_48, %c0_49] : memref<64x32xf32, #tpu.memory_space<vmem>>, vector<64x32xf32>
    %cst_50 = arith.constant dense<0.000000e+00> : vector<8x32xf32>
    %112 = tpu.matmul %110, %111, %cst_50 {dimension_numbers = #tpu.dot_dimension_numbers<[1], [0], [0], [1], [0, 0, 1, 1], [], []>} : vector<8x64xf32>, vector<64x32xf32>, vector<8x32xf32> -> vector<8x32xf32>
    %c0_51 = arith.constant 0 : index
    %c0_52 = arith.constant 0 : index
    %113 = vector.load %arg13[%c0_51, %c0_52] : memref<1x32xf32, #tpu.memory_space<vmem>>, vector<1x32xf32>
    %114 = vector.broadcast %113 : vector<1x32xf32> to vector<8x32xf32>
    %115 = arith.addf %112, %114 : vector<8x32xf32>
    %116 = arith.addf %115, %95 : vector<8x32xf32>
    %117 = vector.shape_cast %116 : vector<8x32xf32> to vector<1x8x32xf32>
    %c0_53 = arith.constant 0 : index
    %c0_54 = arith.constant 0 : index
    %c0_55 = arith.constant 0 : index
    %118 = vector.load %arg14[%c0_53, %c0_54, %c0_55] : memref<1x8x32xf32, #tpu.memory_space<vmem>>, vector<1x8x32xf32>
    tpu.vector_store %arg14[%c0_53, %c0_54, %c0_55], %117 {strides = array<i32>} : memref<1x8x32xf32, #tpu.memory_space<vmem>>, vector<1x8x32xf32>,
    return
  }
  func.func @transform_0(%arg0: i32) -> (i32, i32, i32) {
    %c0_i32 = arith.constant 0 : i32
    %c0_i32_0 = arith.constant 0 : i32
    %c0_i32_1 = arith.constant 0 : i32
    return %arg0, %c0_i32, %c0_i32_0 : i32, i32, i32
  }
  func.func @transform_1(%arg0: i32) -> (i32, i32) {
    %c0_i32 = arith.constant 0 : i32
    %c0_i32_0 = arith.constant 0 : i32
    %c0_i32_1 = arith.constant 0 : i32
    return %c0_i32, %c0_i32_0 : i32, i32
  }
  func.func @transform_2(%arg0: i32) -> (i32, i32) {
    %c0_i32 = arith.constant 0 : i32
    %c0_i32_0 = arith.constant 0 : i32
    %c0_i32_1 = arith.constant 0 : i32
    return %c0_i32, %c0_i32_0 : i32, i32
  }
  func.func @transform_3(%arg0: i32) -> (i32, i32) {
    %c0_i32 = arith.constant 0 : i32
    %c0_i32_0 = arith.constant 0 : i32
    %c0_i32_1 = arith.constant 0 : i32
    return %c0_i32, %c0_i32_0 : i32, i32
  }
  func.func @transform_4(%arg0: i32) -> (i32, i32) {
    %c0_i32 = arith.constant 0 : i32
    %c0_i32_0 = arith.constant 0 : i32
    %c0_i32_1 = arith.constant 0 : i32
    return %c0_i32, %c0_i32_0 : i32, i32
  }
  func.func @transform_5(%arg0: i32) -> (i32, i32) {
    %c0_i32 = arith.constant 0 : i32
    %c0_i32_0 = arith.constant 0 : i32
    %c0_i32_1 = arith.constant 0 : i32
    return %c0_i32, %c0_i32_0 : i32, i32
  }
  func.func @transform_6(%arg0: i32) -> (i32, i32) {
    %c0_i32 = arith.constant 0 : i32
    %c0_i32_0 = arith.constant 0 : i32
    %c0_i32_1 = arith.constant 0 : i32
    return %c0_i32, %c0_i32_0 : i32, i32
  }
  func.func @transform_7(%arg0: i32) -> (i32, i32) {
    %c0_i32 = arith.constant 0 : i32
    %c0_i32_0 = arith.constant 0 : i32
    %c0_i32_1 = arith.constant 0 : i32
    return %c0_i32, %c0_i32_0 : i32, i32
  }
  func.func @transform_8(%arg0: i32) -> (i32, i32) {
    %c0_i32 = arith.constant 0 : i32
    %c0_i32_0 = arith.constant 0 : i32
    %c0_i32_1 = arith.constant 0 : i32
    return %c0_i32, %c0_i32_0 : i32, i32
  }
  func.func @transform_9(%arg0: i32) -> (i32, i32, i32) {
    %c0_i32 = arith.constant 0 : i32
    %c0_i32_0 = arith.constant 0 : i32
    %c0_i32_1 = arith.constant 0 : i32
    %c0_i32_2 = arith.constant 0 : i32
    return %c0_i32, %c0_i32_0, %c0_i32_1 : i32, i32, i32
  }
  func.func @transform_10(%arg0: i32) -> (i32, i32) {
    %c0_i32 = arith.constant 0 : i32
    %c0_i32_0 = arith.constant 0 : i32
    %c0_i32_1 = arith.constant 0 : i32
    return %c0_i32, %c0_i32_0 : i32, i32
  }
  func.func @transform_11(%arg0: i32) -> (i32, i32) {
    %c0_i32 = arith.constant 0 : i32
    %c0_i32_0 = arith.constant 0 : i32
    %c0_i32_1 = arith.constant 0 : i32
    return %c0_i32, %c0_i32_0 : i32, i32
  }
  func.func @transform_12(%arg0: i32) -> (i32, i32) {
    %c0_i32 = arith.constant 0 : i32
    %c0_i32_0 = arith.constant 0 : i32
    %c0_i32_1 = arith.constant 0 : i32
    return %c0_i32, %c0_i32_0 : i32, i32
  }
  func.func @transform_13(%arg0: i32) -> (i32, i32, i32) {
    %c0_i32 = arith.constant 0 : i32
    %c0_i32_0 = arith.constant 0 : i32
    %c0_i32_1 = arith.constant 0 : i32
    return %arg0, %c0_i32, %c0_i32_0 : i32, i32, i32
  }
}

</mosaic_0001>

<bundles_post_ra>
// kernel: tpu_custom_call.1
= control target key start
LH: loop header
LB: loop body
LE: loop exit
PB: predicated region body
PF: predicated region fallthrough
CT: control target
= control target key end

     0   :  { %s1999_s0 = inlined_call_operand.vmem [shape: f32[2,8,32], index: 0, kind: input, shape index: {}]   ;;  %s2000_s1 = inlined_call_operand.vmem [shape: f32[1,32], index: 1, kind: input, shape index: {}]   ;;  %s2001_s2 = inlined_call_operand.vmem [shape: f32[1,32], index: 2, kind: input, shape index: {}]   ;;  %s2002_s3 = inlined_call_operand.vmem [shape: f32[32,96], index: 3, kind: input, shape index: {}]   ;;  %s2003_s4 = inlined_call_operand.vmem [shape: f32[1,96], index: 4, kind: input, shape index: {}]   ;;  %s2004_s5 = inlined_call_operand.vmem [shape: f32[32,32], index: 5, kind: input, shape index: {}]   ;;  %s2005_s6 = inlined_call_operand.vmem [shape: f32[1,32], index: 6, kind: input, shape index: {}]   ;;  %s2006_s7 = inlined_call_operand.vmem [shape: f32[1,32], index: 7, kind: input, shape index: {}]   ;;  %s2007_s8 = inlined_call_operand.vmem [shape: f32[1,32], index: 8, kind: input, shape index: {}]   ;;  %s2008_s9 = inlined_call_operand.hbm [shape: f32[9,32,64], index: 9, kind: input, shape index: {}]   ;;  %s2009_s10 = inlined_call_operand.vmem [shape: f32[1,64], index: 10, kind: input, shape index: {}]   ;;  %s2010_s11 = inlined_call_operand.vmem [shape: f32[64,32], index: 11, kind: input, shape index: {}]   ;;  %s2011_s12 = inlined_call_operand.vmem [shape: f32[1,32], index: 12, kind: input, shape index: {}]   ;;  %s2012_s13 = inlined_call_operand.hbm [shape: f32[2,8,32], index: 13, kind: output, shape index: {}]  }
   0x1   :  { %2014 = sst [smem:[#allocation9_spill]] %s1999_s0 }
   0x2   :  { %2015 = sst [smem:[#allocation10_spill]] %s2000_s1 }
   0x3   :  { %2016 = sst [smem:[#allocation11_spill]] %s2001_s2 }
   0x4   :  { %2017 = sst [smem:[#allocation12_spill]] %s2002_s3 }
   0x5   :  { %18 = vsyncpa [#allocation4], 0 }
   0x6   :  { %19 = vsyncpa [#allocation5], 0 }
   0x7   :  { %21 = vsyncpa [#allocation5 + $0x1], 0  ;;  %s1736_s25 = smov 0   ;;  %s1738_s26 = smov 0  }
   0x8   :  { %s1740_s27 = smov 0   ;;  %s1742_s28 = smov 0  }
   0x9 LB: > { %s1757_s29 = sadd.s32 4294967295, %s1642_s28   ;;  %s1317_s30 = sadd.s32 4294967294, %s1642_s28   ;;  %s1642_s28 = sphi %s1742_s28, %s2032_s28   ;;  %s1638_s27 = sphi %s1740_s27, %s2031_s27   ;;  %s1634_s26 = sphi %s1738_s26, %s2030_s26   ;;  %s1630_s25 = sphi %s1736_s25, %s2029_s25  }
   0xa   : > { %s1761_s14 = sadd.s32 1, %s1642_s28   ;;  %s312_s15 = sadd.s32 1, %s1638_s27 }
   0xb   : > { %s309_s16 = ssub.s32 %s1642_s28, %s1761_s14  ;;  %p322_p0 = scmp.ne.s32.totalorder %s1638_s27, %s1634_s26 }
   0xc   : > { %p310_p1 = scmp.eq.s32.totalorder %s309_s16, 0  ;;  %p323_p2 = scmp.eq.s32.totalorder %s1757_s29, 1 }
   0xd   : > { %p328_p3 = scmp.ne.s32.totalorder %s1634_s26, %s1630_s25  ;;  %p329_p4 = scmp.eq.s32.totalorder %s1317_s30, 1 }
   0xe   : > { %s1772_s17 = scalar_select %p310_p1, %s1638_s27, %s312_s15  }
   0xf   : > { %p1774_p5 = por %p323_p2, %p322_p0  ;;  %p1778_p6 = por %p329_p4, %p328_p3 }
  0x10   : > { %p1318_p7 = scmp.ge.s32.totalorder %s1642_s28, 1  ;;  %p336_p8 = scmp.lt.s32.totalorder %s1642_s28, 3 }
  0x11   : > { %s2019_s19 = scalar_select %p1778_p6, 1, 0 }
  0x12   : > { %p1468_p9 = scmp.eq.s32.totalorder %s1757_s29, 0  ;;  %p1785_p10 = pnand %p1318_p7, %p336_p8 }
  0x13   : > { %s1652_s21 = smov [#allocation3]  }
  0x14   : > { %s372_s22 = sshll.u32 %s1652_s21, 4  ;;  %p1460_p11 = pneg %p1785_p10  ;;  %s373_s22 = int_to_ptr.vmem [resolvable:$true] %s372_s22 }
  0x15   : > { %s1555_s23 = scalar_lea.vmem %s373_s22, 4608  ;;  %p1563_p3 = scmp.lt.s32.totalorder %s373_s22, %s373_s22 }
  0x16   : > { %p1461_p12 = pnand %p1468_p9, %p1460_p11  ;;  %p1556_p0 = scmp.ne.s32.totalorder %s373_s22, %s1555_s23 }
  0x17   : > { %p1564_p4 = scmp.lt.s32.totalorder %s1555_s23, %s1555_s23 }
  0x18   : > { %p1546_p13 = pneg %p1461_p12 }
  0x19   : > { %p1565_p6 = por %p1564_p4, %p1563_p3 }
  0x1a   : > { %p1558_p1 = pnand %p1556_p0, %p1546_p13 }
  0x1c   : > { %p1559_p2 = pneg %p1558_p1 }
  0x1e   : > { %p1566_p7 = pnand %p1565_p6, %p1559_p2 }
  0x20   : > { %1569 = shalt.err (!%p1566_p7)
}
  0x21   : > { %s1653_s24 = smov 128   ;;  %s1654_s30 = smov 8  }
  0x22   : > { %1463 = dma.hbm_to_vmem [thread:$0]  (!%p1461_p12), %s2008_s9, 4608, %s373_s22, [#allocation4], %s1653_s24, %s1653_s24, %s1654_s30  }
  0x23   : > { %404 = sbr.rel (%p1785_p10) target bundleno = 2918 (0xb66), region = 72 }
  0x28   : > { %1621 = dma.done.wait (%p1468_p9), [#allocation4], 4608  }
  0x29   : > { %1623 = vsyncadd (%p1468_p9), [#allocation4], 4294962688  ;;  %vm1017_vm0 = vcmask 257024   ;;  %p447_p6 = scmp.lt.s32.totalorder %s1757_s29, 1  ;;  %v1655_v0 = vmov 0.0   ;;  %s2021_s0 = sld [smem:[#allocation9_spill]] }
  0x2a   : > { %1018 = vst.msk [vmem:[#allocation2] sm:$0xf] %vm1017_vm0, %v1655_v0  ;;  %1019 = vst.msk [vmem:[#allocation2 + $0xc] sm:$0xf] %vm1017_vm0, %v1655_v0  ;;  %1382 = vmatprep.subr.mxu0 %v1655_v0  ;;  %1393 = vmatprep.subr.mxu1 %v1655_v0  ;;  %vm454_vm1 = vcmask 261120   ;;  %s2013_s30 = sand.u32 1, %s1634_s26  }
  0x2b   : > { %s448_s20 = scalar_select %p447_p6, %s1757_s29, 1  ;;  %vm1656_vm2 = vmmov 0   ;;  %v1327_v21 = vld [vmem:[%s2003_s4] ss:$0 sm:$0xff]  ;;  %vm570_vm3 = vcmask 130048   ;;  %vm645_vm4 = vcmask 64512  }
  0x2c   : > { %s2022_s3 = sld [smem:[#allocation12_spill]]  ;;  %1390 = vmatprep.mubr.msk.f32.mxu0 %vm1656_vm2, %v1655_v0  ;;  %1395 = vmatprep.mubr.msk.f32.mxu1 %vm1656_vm2, %v1655_v0  ;;  %s1658_s22 = smov 96   ;;  %v906_v54 = vld [vmem:[%s2004_s5 + $0x18] sm:$0xff]  ;;  %v905_v55 = vld [vmem:[%s2004_s5 + $0x10] sm:$0xff]  ;;  %v904_v56 = vld [vmem:[%s2004_s5 + $0x8] sm:$0xff] }
  0x2d   : > { %s1324_s21 = sshll.u32 %s448_s20, 3  ;;  %s2023_s1 = sld [smem:[#allocation10_spill]]  ;;  %v903_v57 = vld [vmem:[%s2004_s5] sm:$0xff] }
  0x2e   : > { %s2024_s2 = sld [smem:[#allocation11_spill]]  ;;  %s1657_s20 = smov 64   ;;  %v1335_v62 = vld [vmem:[%s2005_s6] ss:$0 sm:$0xff] }
  0x2f   : > { %s450_s24 = scalar_lea.vmem %s2021_s0, %s1324_s21  ;;  %s1822_s21 = sshll.u32 %s2013_s30, 3 }
  0x30   : > { %v451_v1 = vld [vmem:[%s450_s24] sm:$0xff]  ;;  %s1659_s23 = smov 80   ;;  %s1660_s24 = smov 112  }
  0x31   : > { %v455_v2 = vsel %vm454_vm1, %v451_v1, 0.0  ;;  %s1661_s15 = smov 48  }
  0x32   : > { %456 = vadd.xlane.f32.xlu0 %v455_v2  ;;  %v486_v8 = vld [vmem:[%s2022_s3 + $0x18] sm:$0xff]  ;;  %v485_v9 = vld [vmem:[%s2022_s3 + $0x10] sm:$0xff]  ;;  %v484_v10 = vld [vmem:[%s2022_s3 + $0x8] sm:$0xff] }
  0x33   : > { %1383 = vmatpush3.msra.mxu0 %v486_v8  ;;  %v483_v11 = vld [vmem:[%s2022_s3] sm:$0xff] }
  0x34   : > { %1384 = vmatprep.subr.mxu0 %v1655_v0  ;;  %v1325_v16 = vld [vmem:[%s2023_s1] ss:$0 sm:$0xff] }
  0x35   : > { %1385 = vmatpush3.msra.mxu0 %v485_v9  ;;  %v1326_v18 = vld [vmem:[%s2024_s2] ss:$0 sm:$0xff] }
  0x36   : > { %1386 = vmatprep.subr.mxu0 %v1655_v0 }
  0x37   : > { %1387 = vmatpush3.msra.mxu0 %v484_v10  ;;  %v1021_v10 = vlaneseq }
  0x38   : > { %1388 = vmatprep.subr.mxu0 %v1655_v0 }
  0x39   : > { %1389 = vmatpush3.msra.mxu0 %v483_v11  ;;  %v1022_v11 = vshrl.u32 %v1021_v10, 7 }
  0x3a   : > { %1413 = vmatprep.subr.mxu0 %v1655_v0 }
  0xbb   : > { %v457_v3 = vpop.xlane.xlu0 %456 }
  0xbc   : > { %v459_v4 = vmul.f32 0.03125, %v457_v3 }
  0xbe   : > { %v460_v5 = vsub.f32 %v451_v1, %v459_v4 }
  0xc0   : > { %v461_v6 = vmul.f32 %v460_v5, %v460_v5 }
  0xc2   : > { %v462_v7 = vsel %vm454_vm1, %v461_v6, 0.0 }
  0xc3   : > { %463 = vadd.xlane.f32.xlu0 %v462_v7 }
 0x14c   : > { %v464_v12 = vpop.xlane.xlu0 %463 }
 0x14d   : > { %v465_v13 = vmul.f32 0.03125, %v464_v12 }
 0x14f   : > { %v466_v14 = vadd.f32 1e-05, %v465_v13 }
 0x151   : > { %1532 = vrsqrt.f32 %v466_v14 }
 0x15e   : > { %v1533_v15 = vpop.eup %1532 }
 0x15f   : > { %v468_v17 = vmul.f32 %v1533_v15, %v460_v5 }
 0x161   : > { %v475_v19 = vmul.f32 %v1325_v16, %v468_v17  ;;  %v1337_v16 = vld [vmem:[%s2006_s7] ss:$0 sm:$0xff] }
 0x163   : > { %v1844_v20 = vadd.f32 %v1326_v18, %v475_v19  ;;  %v1338_v18 = vld [vmem:[%s2007_s8] ss:$0 sm:$0xff] }
 0x165   : > { %1391 = vmatmul.mubr.msk.f32.vlgmr.msra.gmra.mxu0 %vm454_vm1, %v1844_v20 }
 0x166   : > { %1421 = vmatprep.mubr.msk.f32.mxu0 %vm1656_vm2, %v1655_v0  ;;  %1414 = vmatpush3.msra.mxu0 %v906_v54 }
 0x167   : > { %1415 = vmatprep.subr.mxu0 %v1655_v0 }
 0x168   : > { %1416 = vmatpush3.msra.mxu0 %v905_v55 }
 0x169   : > { %1417 = vmatprep.subr.mxu0 %v1655_v0 }
 0x16a   : > { %1418 = vmatpush3.msra.mxu0 %v904_v56 }
 0x16b   : > { %1419 = vmatprep.subr.mxu0 %v1655_v0 }
 0x16c   : > { %1420 = vmatpush3.msra.mxu0 %v903_v57 }
 0x225   : > { %v563_v22 = vpop.f32.mrf.mxu0 }
 0x226   : > { %v564_v23 = vadd.f32 %v1327_v21, %v563_v22  ;;  %v1644_v21 = vmov 0.0  }
 0x227   : > { %v1392_v24 = vpop.f32.mrf.mxu0 }
 0x228   : > { %657 = vrot.lane.b32.xlu0 %v564_v23, %s1657_s20  ;;  %568 = vrot.lane.b32.xlu1 %v564_v23, %s1658_s22  ;;  %s1662_s20 = smov 16   ;;  %s1906_s22 = smov 0  }
 0x29a   : > { %v569_v25 = vpop.permute.xlu1 %568  ;;  %v658_v26 = vpop.permute.xlu0 %657 }
 0x29b   : > { %1394 = vmatpush3.xpose.msk.msra.mxu1 %vm570_vm3, %v569_v25 }
 0x29c   : > { %1398 = vmatprep.subr.mxu1 %v1655_v0 }
 0x29e   : > { %1396 = vmatmul.mubr.msk.f32.vlgmr.msra.gmra.mxu1 %vm570_vm3, %v564_v23 }
 0x29f   : > { %1399 = vmatpush3.msra.mxu1 %v658_v26  ;;  %1400 = vmatprep.mubr.msk.f32.mxu1 %vm1656_vm2, %v1655_v0 }
 0x2a0   : > { %1403 = vmatprep.subr.mxu1 %v1655_v0 }
 0x35e   : > { %v641_v27 = vpop.f32.mrf.mxu1 }
 0x35f   : > { %v646_v28 = vsel %vm645_vm4, %v641_v27, -inf }
 0x360   : > { %647 = vmax.xlane.f32.xlu1 %v646_v28  ;;  %v1397_v29 = vpop.f32.mrf.mxu1 }
 0x3e9   : > { %v648_v30 = vpop.xlane.xlu1 %647 }
 0x3ea   : > { %v649_v31 = vsub.f32 %v641_v27, %v648_v30 }
 0x3ec   : > { %v650_v32 = vmul.f32 1.442695, %v649_v31 }
 0x3ee   : > { %1534 = vpow2.f32 %v650_v32 }
 0x3fb   : > { %v1535_v33 = vpop.eup %1534 }
 0x3fc   : > { %v652_v34 = vsel %vm645_vm4, %v1535_v33, 0.0 }
 0x3fd   : > { %653 = vadd.xlane.f32.xlu0 %v652_v34 }
 0x413   : > { %735 = vrot.lane.b32.xlu0 %v564_v23, %s1659_s23 }
 0x417   : > { %733 = vrot.lane.b32.xlu0 %v564_v23, %s1660_s24 }
 0x486   : > { %v654_v35 = vpop.xlane.xlu0 %653 }
 0x487   : > { %1536 = vrcp.f32 %v654_v35 }
 0x48a   : > { %v736_v37 = vpop.permute.xlu0 %735 }
 0x48e   : > { %v734_v39 = vpop.permute.xlu0 %733 }
 0x494   : > { %v1537_v36 = vpop.eup %1536 }
 0x495   : > { %v656_v38 = vmul.f32 %v1537_v36, %v1535_v33 }
 0x497   : > { %1401 = vmatmul.mubr.msk.f32.vlgmr.msra.gmra.mxu1 %vm645_vm4, %v656_v38 }
 0x498   : > { %1404 = vmatpush3.xpose.msk.msra.mxu1 %vm570_vm3, %v736_v37  ;;  %1405 = vmatprep.mubr.msk.f32.mxu1 %vm1656_vm2, %v1655_v0 }
 0x499   : > { %1408 = vmatprep.subr.mxu1 %v1655_v0 }
 0x49b   : > { %1406 = vmatmul.mubr.msk.f32.vlgmr.msra.gmra.mxu1 %vm570_vm3, %v734_v39 }
 0x49c   : > { %1410 = vmatprep.mubr.msk.f32.mxu1 %vm1656_vm2, %v1655_v0 }
 0x557   : > { %v729_v40 = vpop.f32.mrf.mxu1 }
 0x559   : > { %v1402_v41 = vpop.f32.mrf.mxu1 }
 0x55b   : > { %v807_v42 = vpop.f32.mrf.mxu1 }
 0x55c   : > { %v811_v43 = vsel %vm645_vm4, %v807_v42, -inf }
 0x55d   : > { %812 = vmax.xlane.f32.xlu1 %v811_v43  ;;  %v1407_v44 = vpop.f32.mrf.mxu1 }
 0x56e   : > { %822 = vrot.lane.b32.xlu1 %v564_v23, %s1661_s15 }
 0x5e6   : > { %v813_v45 = vpop.xlane.xlu1 %812 }
 0x5e7   : > { %v814_v46 = vsub.f32 %v807_v42, %v813_v45 }
 0x5e9   : > { %v815_v47 = vmul.f32 1.442695, %v814_v46 }
 0x5ea   : > { %v823_v48 = vpop.permute.xlu1 %822 }
 0x5eb   : > { %1538 = vpow2.f32 %v815_v47  ;;  %1409 = vmatpush3.msra.mxu1 %v823_v48 }
 0x5f8   : > { %v1539_v49 = vpop.eup %1538 }
 0x5f9   : > { %v817_v50 = vsel %vm645_vm4, %v1539_v49, 0.0 }
 0x5fa   : > { %818 = vadd.xlane.f32.xlu0 %v817_v50 }
 0x683   : > { %v819_v51 = vpop.xlane.xlu0 %818 }
 0x684   : > { %1540 = vrcp.f32 %v819_v51 }
 0x691   : > { %v1541_v52 = vpop.eup %1540 }
 0x692   : > { %v821_v53 = vmul.f32 %v1541_v52, %v1539_v49 }
 0x694   : > { %1411 = vmatmul.mubr.msk.f32.vlgmr.msra.gmra.mxu1 %vm645_vm4, %v821_v53 }
 0x754   : > { %v894_v58 = vpop.f32.mrf.mxu1 }
 0x755   : > { %899 = vrot.lane.b32.xlu1 %v894_v58, %s1662_s20 }
 0x756   : > { %v1412_v59 = vpop.f32.mrf.mxu1 }
 0x7c7   : > { %v900_v60 = vpop.permute.xlu1 %899 }
 0x7c8   : > { %v902_v61 = vsel %vm570_vm3, %v729_v40, %v900_v60 }
 0x7c9   : > { %1422 = vmatmul.mubr.msk.f32.vlgmr.msra.gmra.mxu0 %vm454_vm1, %v902_v61 }
 0x889   : > { %v983_v63 = vpop.f32.mrf.mxu0 }
 0x88a   : > { %v984_v1 = vadd.f32 %v1335_v62, %v983_v63 }
 0x88b   : > { %v1423_v2 = vpop.f32.mrf.mxu0 }
 0x88c   : > { %v987_v3 = vadd.f32 %v984_v1, %v1844_v20 }
 0x88e   : > { %v990_v4 = vsel %vm454_vm1, %v987_v3, 0.0 }
 0x88f   : > { %991 = vadd.xlane.f32.xlu1 %v990_v4 }
 0x918   : > { %v992_v5 = vpop.xlane.xlu1 %991 }
 0x919   : > { %v993_v6 = vmul.f32 0.03125, %v992_v5 }
 0x91b   : > { %v994_v7 = vsub.f32 %v987_v3, %v993_v6 }
 0x91d   : > { %v995_v8 = vmul.f32 %v994_v7, %v994_v7 }
 0x91f   : > { %v996_v9 = vsel %vm454_vm1, %v995_v8, 0.0 }
 0x920   : > { %997 = vadd.xlane.f32.xlu0 %v996_v9 }
 0x9a9   : > { %v998_v12 = vpop.xlane.xlu0 %997 }
 0x9aa   : > { %v999_v13 = vmul.f32 0.03125, %v998_v12 }
 0x9ac   : > { %v1000_v14 = vadd.f32 1e-05, %v999_v13 }
 0x9ae   : > { %1542 = vrsqrt.f32 %v1000_v14 }
 0x9bb   : > { %v1543_v15 = vpop.eup %1542 }
 0x9bc   : > { %v1002_v17 = vmul.f32 %v1543_v15, %v994_v7 }
 0x9be   : > { %v1009_v19 = vmul.f32 %v1337_v16, %v1002_v17 }
 0x9c0   : > { %v1901_v20 = vadd.f32 %v1338_v18, %v1009_v19 }
 0x9c2   : > { %1020 = vst.msk [vmem:[#allocation2 + $0x4] sm:$0xff] %vm454_vm1, %v1901_v20 }
 0x9c3 LB: >> { %v1663_v22 = vmov 0.0   ;;  %vm1664_vm5 = vmmov 0   ;;  %s1339_s23 = sadd.s32 4294967292, %s1650_s22  ;;  %s1341_s30 = sshll.u32 %s1650_s22, 5  ;;  %s1650_s22 = sphi %s1906_s22, %s1028_s22   ;;  %v1646_v21 = vphi %v1644_v21, %v1645_v21  }
 0x9c4   : >> { %1424 = vmatprep.subr.mxu0 %v1663_v22  ;;  %1432 = vmatprep.mubr.msk.f32.mxu0 %vm1664_vm5, %v1663_v22  ;;  %v1031_v23 = vstv %s1339_s23  ;;  %s1042_s24 = scalar_lea.vmem [#allocation3], %s1341_s30  ;;  %s1036_s15 = scalar_lea.vmem [#allocation2], %s1650_s22 }
 0x9c5   : >> { %v1046_v24 = vld [vmem:[%s1042_s24 + $0x18] sm:$0xff]  ;;  %v1045_v25 = vld [vmem:[%s1042_s24 + $0x10] sm:$0xff]  ;;  %v1032_v26 = vadd.s32 %v1031_v23, %v1022_v11  ;;  %v1044_v27 = vld [vmem:[%s1042_s24 + $0x8] sm:$0xff]  ;;  %s1028_s22 = sadd.s32 1, %s1650_s22  }
 0x9c6   : >> { %1425 = vmatpush3.msra.mxu0 %v1046_v24  ;;  %v1043_v29 = vld [vmem:[%s1042_s24] sm:$0xff]  ;;  %p1025_p8 = scmp.ge.s32.totalorder %s1028_s22, 9  }
 0x9c7   : >> { %1426 = vmatprep.subr.mxu0 %v1663_v22  ;;  %vm1033_vm6 = vcmp.ge.s32.totalorder %v1032_v26, 0  ;;  %vm1034_vm7 = vcmp.lt.s32.totalorder %v1032_v26, 8  ;;  %v1137_v35 = vld [vmem:[%s2010_s11 + $0x38] sm:$0xff] (%p1025_p8)  ;;  %v1136_v36 = vld [vmem:[%s2010_s11 + $0x30] sm:$0xff] (%p1025_p8)  ;;  %v1135_v37 = vld [vmem:[%s2010_s11 + $0x28] sm:$0xff] (%p1025_p8)  ;;  %vm1145_vm9 = vcmask (%p1025_p8), 523264  }
 0x9c8   : >> { %1427 = vmatpush3.msra.mxu0 %v1045_v25  ;;  %vm1035_vm8 = vmand %vm1033_vm6, %vm1034_vm7  ;;  %v1134_v38 = vld [vmem:[%s2010_s11 + $0x20] sm:$0xff] (%p1025_p8)  ;;  %v1133_v40 = vld [vmem:[%s2010_s11 + $0x18] sm:$0xff] (%p1025_p8)  ;;  %s1347_s20 = sshll.u32 (%p1025_p8), %s1757_s29, 7  ;;  %s2027_s2 = sand.u32 (%p1025_p8), 1, %s1634_s26  }
 0x9c9   : >> { %v1037_v28 = vld [vmem:[%s1036_s15] sm:$0xff]  ;;  %1428 = vmatprep.subr.mxu0 %v1663_v22  ;;  %v1340_v30 = vsel %vm1035_vm8, 1.0, %v1663_v22  ;;  %v1132_v41 = vld [vmem:[%s2010_s11 + $0x10] sm:$0xff] (%p1025_p8)  ;;  %v1131_v43 = vld [vmem:[%s2010_s11 + $0x8] sm:$0xff] (%p1025_p8)  ;;  %s2025_s15 = scalar_lea.vmem (%p1025_p8), [#allocation6], %s1822_s21  ;;  %s1233_s23 = scalar_lea.hbm (%p1025_p8), %s2012_s13, %s1347_s20 }
 0x9ca   : >> { %1429 = vmatpush3.msra.mxu0 %v1044_v27  ;;  %v1040_v31 = vmul.f32 %v1340_v30, %v1037_v28  ;;  %v1343_v39 = vld [vmem:[%s2009_s10] ss:$0 sm:$0xff] (%p1025_p8)  ;;  %s1235_s22 = sshll.u32 (%p1025_p8), %s2025_s15, 4  ;;  %s2026_s1 = smov (%p1025_p8), %s2025_s15  ;;  %s1236_s22 = int_to_ptr.vmem [resolvable:$true] %s1235_s22 }
 0x9cb   : >> { %1430 = vmatprep.subr.mxu0 %v1663_v22  ;;  %v1130_v44 = vld [vmem:[%s2010_s11] sm:$0xff] (%p1025_p8)  ;;  %s1222_s3 = scalar_lea.sflag (%p1025_p8), [#allocation5], %s2027_s2  ;;  %s1570_s30 = scalar_lea.vmem (%p1025_p8), %s1236_s22, 128 }
 0x9cc   : >> { %1431 = vmatpush3.msra.mxu0 %v1043_v29  ;;  %v1344_v46 = vld [vmem:[%s2011_s12] ss:$0 sm:$0xff] (%p1025_p8)  ;;  %p1571_p9 = scmp.ne.s32.totalorder (%p1025_p8), %s1236_s22, %s1570_s30  ;;  %s1665_s29 = smov (%p1025_p8), [#allocation6]  }
 0x9cd   : >> { %1433 = vmatmul.mubr.msk.f32.vlgmr.msra.gmra.mxu0 %vm454_vm1, %v1040_v31  ;;  %1435 = vmatprep.subr.mxu0 (%p1025_p8), %v1655_v0  ;;  %s1574_s24 = sshll.u32 (%p1025_p8), %s1665_s29, 4  ;;  %s1575_s24 = int_to_ptr.vmem [resolvable:$false] %s1574_s24 }
 0x9ce   : > { %1451 = vmatprep.mubr.msk.f32.mxu0 (%p1025_p8), %vm1656_vm2, %v1655_v0  ;;  %1436 = vmatpush3.msra.mxu0 (%p1025_p8), %v1137_v35  ;;  %p1572_p10 = pnand (%p1025_p8), %p1571_p9, %p1774_p5  ;;  %s1576_s15 = scalar_lea.vmem (%p1025_p8), %s1575_s24, 256 }
 0x9cf   : > { %1437 = vmatprep.subr.mxu0 (%p1025_p8), %v1655_v0  ;;  %p1577_p12 = scmp.lt.s32.totalorder (%p1025_p8), %s1236_s22, %s1575_s24  ;;  %p1578_p13 = scmp.lt.s32.totalorder (%p1025_p8), %s1576_s15, %s1570_s30 }
 0x9d0   : > { %1438 = vmatpush3.msra.mxu0 (%p1025_p8), %v1136_v36  ;;  %p1573_p11 = pneg (%p1025_p8), %p1572_p10 }
 0x9d1   : > { %1439 = vmatprep.subr.mxu0 (%p1025_p8), %v1655_v0  ;;  %p1579_p0 = por (%p1025_p8), %p1578_p13, %p1577_p12 }
 0x9d2   : > { %1440 = vmatpush3.msra.mxu0 (%p1025_p8), %v1135_v37 }
 0x9d3   : > { %1441 = vmatprep.subr.mxu0 (%p1025_p8), %v1655_v0  ;;  %p1580_p1 = pnand (%p1025_p8), %p1579_p0, %p1573_p11 }
 0x9d4   : > { %1442 = vmatpush3.msra.mxu0 (%p1025_p8), %v1134_v38 }
 0x9d5   : > { %1443 = vmatprep.subr.mxu0 (%p1025_p8), %v1655_v0 }
 0x9d6   : > { %1444 = vmatpush3.msra.mxu0 (%p1025_p8), %v1133_v40 }
 0x9d7   : > { %1445 = vmatprep.subr.mxu0 (%p1025_p8), %v1655_v0 }
 0x9d8   : > { %1446 = vmatpush3.msra.mxu0 (%p1025_p8), %v1132_v41 }
 0x9d9   : > { %1447 = vmatprep.subr.mxu0 (%p1025_p8), %v1655_v0 }
 0x9da   : > { %1448 = vmatpush3.msra.mxu0 (%p1025_p8), %v1131_v43 }
 0x9db   : > { %1449 = vmatprep.subr.mxu0 (%p1025_p8), %v1655_v0 }
 0x9dc   : > { %1450 = vmatpush3.msra.mxu0 (%p1025_p8), %v1130_v44 }
 0xa8c   : > { %1027 = sbr.rel (!%p1025_p8) target bundleno = 2499 (0x9c3), region = 121 }
 0xa8d   : >> { %v1116_v32 = vpop.f32.mrf.mxu0 }
 0xa8e   : >> { %v1120_v33 = vadd.f32 %v1646_v21, %v1116_v32  }
 0xa8f   : >> { %v1434_v34 = vpop.f32.mrf.mxu0 }
 0xa90   : >> { %v1645_v21 = vmov %v1120_v33   ;;  %v1128_v42 = vadd.f32 (%p1025_p8), %v1343_v39, %v1120_v33 }
 0xa92   : > { %v1129_v45 = vmax.f32 %v1128_v42, 0.0 }
 0xa94   : > { %1452 = vmatmul.mubr.msk.f32.vlgmr.msra.gmra.mxu0 %vm1145_vm9, %v1129_v45 }
 0xb54   : > { %v1215_v47 = vpop.f32.mrf.mxu0 }
 0xb55   : > { %v1216_v48 = vadd.f32 %v1344_v46, %v1215_v47 }
 0xb56   : > { %v1453_v49 = vpop.f32.mrf.mxu0 }
 0xb57   : > { %v1219_v50 = vadd.f32 %v1216_v48, %v1901_v20 }
 0xb59   : > { %1220 = vst.msk [vmem:[%s2026_s1] sm:$0xff] %vm454_vm1, %v1219_v50 }
 0xb5a   : > { %1583 = shalt.err (!%p1580_p1)
}
 0xb5b   : > { %s1584_s20 = scalar_lea.hbm %s1233_s23, 128  ;;  %s1588_s21 = scalar_lea.hbm %s2012_s13, 256 }
 0xb5c   : > { %p1585_p2 = scmp.ne.s32.totalorder %s1233_s23, %s1584_s20  ;;  %p1589_p7 = scmp.lt.s32.totalorder %s1233_s23, %s2012_s13 }
 0xb5d   : > { %p1590_p6 = scmp.lt.s32.totalorder %s1588_s21, %s1584_s20 }
 0xb5e   : > { %p1586_p3 = pnand %p1585_p2, %p1774_p5 }
 0xb5f   : > { %p1591_p8 = por %p1590_p6, %p1589_p7 }
 0xb60   : > { %p1587_p4 = pneg %p1586_p3 }
 0xb62   : > { %p1592_p9 = pnand %p1591_p8, %p1587_p4 }
 0xb64   : > { %1595 = shalt.err (!%p1592_p9)
}
 0xb65   : > { %1458 = dma.vmem_to_hbm [thread:$0]  (%p1774_p5), %s1236_s22, 128, %s1233_s23, %s1222_s3  }
 0xb66 PF: > { %p1470_p10 = scmp.ge.s32.totalorder %s1642_s28, 2  ;;  %s1247_s30 = sand.u32 1, %s1630_s25  }
 0xb67   : > { %p2028_p11 = scmp.ne.s32.totalorder %s2019_s19, 0  ;;  %s1248_s29 = scalar_lea.sflag [#allocation5], %s1247_s30 }
 0xb69   : > { %p1465_p12 = pnand %p1470_p10, %p2028_p11 }
 0xb6b   : > { %p1466_p13 = pneg %p1465_p12 }
 0xb6d   : > { %1625 = dma.done.wait (%p1466_p13), %s1248_s29, 128  }
 0xb6e   : > { %1627 = vsyncadd (%p1466_p13), %s1248_s29, 4294967168  ;;  %p24_p0 = scmp.ge.s32.totalorder %s1761_s14, 4   ;;  %s2029_s25 = smov %s1634_s26 }
 0xb6f   : > { %s2030_s26 = smov %s1638_s27  ;;  %s2031_s27 = smov %s1772_s17 }
 0xb70   : > { %s2032_s28 = smov %s1761_s14  ;;  %26 = sbr.rel (!%p24_p0) target bundleno = 9 (0x9), region = 132 }
 0xb75   :  { %1253 = vsyncpa [#allocation4], 1 }
 0xb76   :  { %1255 = vsyncpa [#allocation4 + $0x1], 1 }
 0xb77   :  { %1256 = vsyncpa [#allocation5], 1 }
 0xb78   :  { %1258 = vsyncpa [#allocation5 + $0x1], 1 }

// kernel: tpu_custom_call.1
= control target key start
LH: loop header
LB: loop body
LE: loop exit
PB: predicated region body
PF: predicated region fallthrough
CT: control target
= control target key end

     0   :  { %s1999_s0 = inlined_call_operand.vmem [shape: f32[2,8,32], index: 0, kind: input, shape index: {}]   ;;  %s2000_s1 = inlined_call_operand.vmem [shape: f32[1,32], index: 1, kind: input, shape index: {}]   ;;  %s2001_s2 = inlined_call_operand.vmem [shape: f32[1,32], index: 2, kind: input, shape index: {}]   ;;  %s2002_s3 = inlined_call_operand.vmem [shape: f32[32,96], index: 3, kind: input, shape index: {}]   ;;  %s2003_s4 = inlined_call_operand.vmem [shape: f32[1,96], index: 4, kind: input, shape index: {}]   ;;  %s2004_s5 = inlined_call_operand.vmem [shape: f32[32,32], index: 5, kind: input, shape index: {}]   ;;  %s2005_s6 = inlined_call_operand.vmem [shape: f32[1,32], index: 6, kind: input, shape index: {}]   ;;  %s2006_s7 = inlined_call_operand.vmem [shape: f32[1,32], index: 7, kind: input, shape index: {}]   ;;  %s2007_s8 = inlined_call_operand.vmem [shape: f32[1,32], index: 8, kind: input, shape index: {}]   ;;  %s2008_s9 = inlined_call_operand.hbm [shape: f32[9,32,64], index: 9, kind: input, shape index: {}]   ;;  %s2009_s10 = inlined_call_operand.vmem [shape: f32[1,64], index: 10, kind: input, shape index: {}]   ;;  %s2010_s11 = inlined_call_operand.vmem [shape: f32[64,32], index: 11, kind: input, shape index: {}]   ;;  %s2011_s12 = inlined_call_operand.vmem [shape: f32[1,32], index: 12, kind: input, shape index: {}]   ;;  %s2012_s13 = inlined_call_operand.hbm [shape: f32[2,8,32], index: 13, kind: output, shape index: {}]  }
   0x1   :  { %2014 = sst [smem:[#allocation9_spill]] %s1999_s0 }
   0x2   :  { %2015 = sst [smem:[#allocation10_spill]] %s2000_s1 }
   0x3   :  { %2016 = sst [smem:[#allocation11_spill]] %s2001_s2 }
   0x4   :  { %2017 = sst [smem:[#allocation12_spill]] %s2002_s3 }
   0x5   :  { %18 = vsyncpa [#allocation4], 0 }
   0x6   :  { %19 = vsyncpa [#allocation5], 0 }
   0x7   :  { %21 = vsyncpa [#allocation5 + $0x1], 0  ;;  %s1736_s25 = smov 0   ;;  %s1738_s26 = smov 0  }
   0x8   :  { %s1740_s27 = smov 0   ;;  %s1742_s28 = smov 0  }
   0x9 LB: > { %s1757_s29 = sadd.s32 4294967295, %s1642_s28   ;;  %s1317_s30 = sadd.s32 4294967294, %s1642_s28   ;;  %s1642_s28 = sphi %s1742_s28, %s2032_s28   ;;  %s1638_s27 = sphi %s1740_s27, %s2031_s27   ;;  %s1634_s26 = sphi %s1738_s26, %s2030_s26   ;;  %s1630_s25 = sphi %s1736_s25, %s2029_s25  }
   0xa   : > { %s1761_s14 = sadd.s32 1, %s1642_s28   ;;  %s312_s15 = sadd.s32 1, %s1638_s27 }
   0xb   : > { %s309_s16 = ssub.s32 %s1642_s28, %s1761_s14  ;;  %p322_p0 = scmp.ne.s32.totalorder %s1638_s27, %s1634_s26 }
   0xc   : > { %p310_p1 = scmp.eq.s32.totalorder %s309_s16, 0  ;;  %p323_p2 = scmp.eq.s32.totalorder %s1757_s29, 1 }
   0xd   : > { %p328_p3 = scmp.ne.s32.totalorder %s1634_s26, %s1630_s25  ;;  %p329_p4 = scmp.eq.s32.totalorder %s1317_s30, 1 }
   0xe   : > { %s1772_s17 = scalar_select %p310_p1, %s1638_s27, %s312_s15  }
   0xf   : > { %p1774_p5 = por %p323_p2, %p322_p0  ;;  %p1778_p6 = por %p329_p4, %p328_p3 }
  0x10   : > { %p1318_p7 = scmp.ge.s32.totalorder %s1642_s28, 1  ;;  %p336_p8 = scmp.lt.s32.totalorder %s1642_s28, 3 }
  0x11   : > { %s2019_s19 = scalar_select %p1778_p6, 1, 0 }
  0x12   : > { %p1468_p9 = scmp.eq.s32.totalorder %s1757_s29, 0  ;;  %p1785_p10 = pnand %p1318_p7, %p336_p8 }
  0x13   : > { %s1652_s21 = smov [#allocation3]  }
  0x14   : > { %s372_s22 = sshll.u32 %s1652_s21, 4  ;;  %p1460_p11 = pneg %p1785_p10  ;;  %s373_s22 = int_to_ptr.vmem [resolvable:$true] %s372_s22 }
  0x15   : > { %s1555_s23 = scalar_lea.vmem %s373_s22, 4608  ;;  %p1563_p3 = scmp.lt.s32.totalorder %s373_s22, %s373_s22 }
  0x16   : > { %p1461_p12 = pnand %p1468_p9, %p1460_p11  ;;  %p1556_p0 = scmp.ne.s32.totalorder %s373_s22, %s1555_s23 }
  0x17   : > { %p1564_p4 = scmp.lt.s32.totalorder %s1555_s23, %s1555_s23 }
  0x18   : > { %p1546_p13 = pneg %p1461_p12 }
  0x19   : > { %p1565_p6 = por %p1564_p4, %p1563_p3 }
  0x1a   : > { %p1558_p1 = pnand %p1556_p0, %p1546_p13 }
  0x1c   : > { %p1559_p2 = pneg %p1558_p1 }
  0x1e   : > { %p1566_p7 = pnand %p1565_p6, %p1559_p2 }
  0x20   : > { %1569 = shalt.err (!%p1566_p7)
}
  0x21   : > { %s1653_s24 = smov 128   ;;  %s1654_s30 = smov 8  }
  0x22   : > { %1463 = dma.hbm_to_vmem [thread:$0]  (!%p1461_p12), %s2008_s9, 4608, %s373_s22, [#allocation4], %s1653_s24, %s1653_s24, %s1654_s30  }
  0x23   : > { %404 = sbr.rel (%p1785_p10) target bundleno = 2918 (0xb66), region = 72 }
  0x28   : > { %1621 = dma.done.wait (%p1468_p9), [#allocation4], 4608  }
  0x29   : > { %1623 = vsyncadd (%p1468_p9), [#allocation4], 4294962688  ;;  %vm1017_vm0 = vcmask 257024   ;;  %p447_p6 = scmp.lt.s32.totalorder %s1757_s29, 1  ;;  %v1655_v0 = vmov 0.0   ;;  %s2021_s0 = sld [smem:[#allocation9_spill]] }
  0x2a   : > { %1018 = vst.msk [vmem:[#allocation2] sm:$0xf] %vm1017_vm0, %v1655_v0  ;;  %1019 = vst.msk [vmem:[#allocation2 + $0xc] sm:$0xf] %vm1017_vm0, %v1655_v0  ;;  %1382 = vmatprep.subr.mxu0 %v1655_v0  ;;  %1393 = vmatprep.subr.mxu1 %v1655_v0  ;;  %vm454_vm1 = vcmask 261120   ;;  %s2013_s30 = sand.u32 1, %s1634_s26  }
  0x2b   : > { %s448_s20 = scalar_select %p447_p6, %s1757_s29, 1  ;;  %vm1656_vm2 = vmmov 0   ;;  %v1327_v21 = vld [vmem:[%s2003_s4] ss:$0 sm:$0xff]  ;;  %vm570_vm3 = vcmask 130048   ;;  %vm645_vm4 = vcmask 64512  }
  0x2c   : > { %s2022_s3 = sld [smem:[#allocation12_spill]]  ;;  %1390 = vmatprep.mubr.msk.f32.mxu0 %vm1656_vm2, %v1655_v0  ;;  %1395 = vmatprep.mubr.msk.f32.mxu1 %vm1656_vm2, %v1655_v0  ;;  %s1658_s22 = smov 96   ;;  %v906_v54 = vld [vmem:[%s2004_s5 + $0x18] sm:$0xff]  ;;  %v905_v55 = vld [vmem:[%s2004_s5 + $0x10] sm:$0xff]  ;;  %v904_v56 = vld [vmem:[%s2004_s5 + $0x8] sm:$0xff] }
  0x2d   : > { %s1324_s21 = sshll.u32 %s448_s20, 3  ;;  %s2023_s1 = sld [smem:[#allocation10_spill]]  ;;  %v903_v57 = vld [vmem:[%s2004_s5] sm:$0xff] }
  0x2e   : > { %s2024_s2 = sld [smem:[#allocation11_spill]]  ;;  %s1657_s20 = smov 64   ;;  %v1335_v62 = vld [vmem:[%s2005_s6] ss:$0 sm:$0xff] }
  0x2f   : > { %s450_s24 = scalar_lea.vmem %s2021_s0, %s1324_s21  ;;  %s1822_s21 = sshll.u32 %s2013_s30, 3 }
  0x30   : > { %v451_v1 = vld [vmem:[%s450_s24] sm:$0xff]  ;;  %s1659_s23 = smov 80   ;;  %s1660_s24 = smov 112  }
  0x31   : > { %v455_v2 = vsel %vm454_vm1, %v451_v1, 0.0  ;;  %s1661_s15 = smov 48  }
  0x32   : > { %456 = vadd.xlane.f32.xlu0 %v455_v2  ;;  %v486_v8 = vld [vmem:[%s2022_s3 + $0x18] sm:$0xff]  ;;  %v485_v9 = vld [vmem:[%s2022_s3 + $0x10] sm:$0xff]  ;;  %v484_v10 = vld [vmem:[%s2022_s3 + $0x8] sm:$0xff] }
  0x33   : > { %1383 = vmatpush3.msra.mxu0 %v486_v8  ;;  %v483_v11 = vld [vmem:[%s2022_s3] sm:$0xff] }
  0x34   : > { %1384 = vmatprep.subr.mxu0 %v1655_v0  ;;  %v1325_v16 = vld [vmem:[%s2023_s1] ss:$0 sm:$0xff] }
  0x35   : > { %1385 = vmatpush3.msra.mxu0 %v485_v9  ;;  %v1326_v18 = vld [vmem:[%s2024_s2] ss:$0 sm:$0xff] }
  0x36   : > { %1386 = vmatprep.subr.mxu0 %v1655_v0 }
  0x37   : > { %1387 = vmatpush3.msra.mxu0 %v484_v10  ;;  %v1021_v10 = vlaneseq }
  0x38   : > { %1388 = vmatprep.subr.mxu0 %v1655_v0 }
  0x39   : > { %1389 = vmatpush3.msra.mxu0 %v483_v11  ;;  %v1022_v11 = vshrl.u32 %v1021_v10, 7 }
  0x3a   : > { %1413 = vmatprep.subr.mxu0 %v1655_v0 }
  0xbb   : > { %v457_v3 = vpop.xlane.xlu0 %456 }
  0xbc   : > { %v459_v4 = vmul.f32 0.03125, %v457_v3 }
  0xbe   : > { %v460_v5 = vsub.f32 %v451_v1, %v459_v4 }
  0xc0   : > { %v461_v6 = vmul.f32 %v460_v5, %v460_v5 }
  0xc2   : > { %v462_v7 = vsel %vm454_vm1, %v461_v6, 0.0 }
  0xc3   : > { %463 = vadd.xlane.f32.xlu0 %v462_v7 }
 0x14c   : > { %v464_v12 = vpop.xlane.xlu0 %463 }
 0x14d   : > { %v465_v13 = vmul.f32 0.03125, %v464_v12 }
 0x14f   : > { %v466_v14 = vadd.f32 1e-05, %v465_v13 }
 0x151   : > { %1532 = vrsqrt.f32 %v466_v14 }
 0x15e   : > { %v1533_v15 = vpop.eup %1532 }
 0x15f   : > { %v468_v17 = vmul.f32 %v1533_v15, %v460_v5 }
 0x161   : > { %v475_v19 = vmul.f32 %v1325_v16, %v468_v17  ;;  %v1337_v16 = vld [vmem:[%s2006_s7] ss:$0 sm:$0xff] }
 0x163   : > { %v1844_v20 = vadd.f32 %v1326_v18, %v475_v19  ;;  %v1338_v18 = vld [vmem:[%s2007_s8] ss:$0 sm:$0xff] }
 0x165   : > { %1391 = vmatmul.mubr.msk.f32.vlgmr.msra.gmra.mxu0 %vm454_vm1, %v1844_v20 }
 0x166   : > { %1421 = vmatprep.mubr.msk.f32.mxu0 %vm1656_vm2, %v1655_v0  ;;  %1414 = vmatpush3.msra.mxu0 %v906_v54 }
 0x167   : > { %1415 = vmatprep.subr.mxu0 %v1655_v0 }
 0x168   : > { %1416 = vmatpush3.msra.mxu0 %v905_v55 }
 0x169   : > { %1417 = vmatprep.subr.mxu0 %v1655_v0 }
 0x16a   : > { %1418 = vmatpush3.msra.mxu0 %v904_v56 }
 0x16b   : > { %1419 = vmatprep.subr.mxu0 %v1655_v0 }
 0x16c   : > { %1420 = vmatpush3.msra.mxu0 %v903_v57 }
 0x225   : > { %v563_v22 = vpop.f32.mrf.mxu0 }
 0x226   : > { %v564_v23 = vadd.f32 %v1327_v21, %v563_v22  ;;  %v1644_v21 = vmov 0.0  }
 0x227   : > { %v1392_v24 = vpop.f32.mrf.mxu0 }
 0x228   : > { %657 = vrot.lane.b32.xlu0 %v564_v23, %s1657_s20  ;;  %568 = vrot.lane.b32.xlu1 %v564_v23, %s1658_s22  ;;  %s1662_s20 = smov 16   ;;  %s1906_s22 = smov 0  }
 0x29a   : > { %v569_v25 = vpop.permute.xlu1 %568  ;;  %v658_v26 = vpop.permute.xlu0 %657 }
 0x29b   : > { %1394 = vmatpush3.xpose.msk.msra.mxu1 %vm570_vm3, %v569_v25 }
 0x29c   : > { %1398 = vmatprep.subr.mxu1 %v1655_v0 }
 0x29e   : > { %1396 = vmatmul.mubr.msk.f32.vlgmr.msra.gmra.mxu1 %vm570_vm3, %v564_v23 }
 0x29f   : > { %1399 = vmatpush3.msra.mxu1 %v658_v26  ;;  %1400 = vmatprep.mubr.msk.f32.mxu1 %vm1656_vm2, %v1655_v0 }
 0x2a0   : > { %1403 = vmatprep.subr.mxu1 %v1655_v0 }
 0x35e   : > { %v641_v27 = vpop.f32.mrf.mxu1 }
 0x35f   : > { %v646_v28 = vsel %vm645_vm4, %v641_v27, -inf }
 0x360   : > { %647 = vmax.xlane.f32.xlu1 %v646_v28  ;;  %v1397_v29 = vpop.f32.mrf.mxu1 }
 0x3e9   : > { %v648_v30 = vpop.xlane.xlu1 %647 }
 0x3ea   : > { %v649_v31 = vsub.f32 %v641_v27, %v648_v30 }
 0x3ec   : > { %v650_v32 = vmul.f32 1.442695, %v649_v31 }
 0x3ee   : > { %1534 = vpow2.f32 %v650_v32 }
 0x3fb   : > { %v1535_v33 = vpop.eup %1534 }
 0x3fc   : > { %v652_v34 = vsel %vm645_vm4, %v1535_v33, 0.0 }
 0x3fd   : > { %653 = vadd.xlane.f32.xlu0 %v652_v34 }
 0x413   : > { %735 = vrot.lane.b32.xlu0 %v564_v23, %s1659_s23 }
 0x417   : > { %733 = vrot.lane.b32.xlu0 %v564_v23, %s1660_s24 }
 0x486   : > { %v654_v35 = vpop.xlane.xlu0 %653 }
 0x487   : > { %1536 = vrcp.f32 %v654_v35 }
 0x48a   : > { %v736_v37 = vpop.permute.xlu0 %735 }
 0x48e   : > { %v734_v39 = vpop.permute.xlu0 %733 }
 0x494   : > { %v1537_v36 = vpop.eup %1536 }
 0x495   : > { %v656_v38 = vmul.f32 %v1537_v36, %v1535_v33 }
 0x497   : > { %1401 = vmatmul.mubr.msk.f32.vlgmr.msra.gmra.mxu1 %vm645_vm4, %v656_v38 }
 0x498   : > { %1404 = vmatpush3.xpose.msk.msra.mxu1 %vm570_vm3, %v736_v37  ;;  %1405 = vmatprep.mubr.msk.f32.mxu1 %vm1656_vm2, %v1655_v0 }
 0x499   : > { %1408 = vmatprep.subr.mxu1 %v1655_v0 }
 0x49b   : > { %1406 = vmatmul.mubr.msk.f32.vlgmr.msra.gmra.mxu1 %vm570_vm3, %v734_v39 }
 0x49c   : > { %1410 = vmatprep.mubr.msk.f32.mxu1 %vm1656_vm2, %v1655_v0 }
 0x557   : > { %v729_v40 = vpop.f32.mrf.mxu1 }
 0x559   : > { %v1402_v41 = vpop.f32.mrf.mxu1 }
 0x55b   : > { %v807_v42 = vpop.f32.mrf.mxu1 }
 0x55c   : > { %v811_v43 = vsel %vm645_vm4, %v807_v42, -inf }
 0x55d   : > { %812 = vmax.xlane.f32.xlu1 %v811_v43  ;;  %v1407_v44 = vpop.f32.mrf.mxu1 }
 0x56e   : > { %822 = vrot.lane.b32.xlu1 %v564_v23, %s1661_s15 }
 0x5e6   : > { %v813_v45 = vpop.xlane.xlu1 %812 }
 0x5e7   : > { %v814_v46 = vsub.f32 %v807_v42, %v813_v45 }
 0x5e9   : > { %v815_v47 = vmul.f32 1.442695, %v814_v46 }
 0x5ea   : > { %v823_v48 = vpop.permute.xlu1 %822 }
 0x5eb   : > { %1538 = vpow2.f32 %v815_v47  ;;  %1409 = vmatpush3.msra.mxu1 %v823_v48 }
 0x5f8   : > { %v1539_v49 = vpop.eup %1538 }
 0x5f9   : > { %v817_v50 = vsel %vm645_vm4, %v1539_v49, 0.0 }
 0x5fa   : > { %818 = vadd.xlane.f32.xlu0 %v817_v50 }
 0x683   : > { %v819_v51 = vpop.xlane.xlu0 %818 }
 0x684   : > { %1540 = vrcp.f32 %v819_v51 }
 0x691   : > { %v1541_v52 = vpop.eup %1540 }
 0x692   : > { %v821_v53 = vmul.f32 %v1541_v52, %v1539_v49 }
 0x694   : > { %1411 = vmatmul.mubr.msk.f32.vlgmr.msra.gmra.mxu1 %vm645_vm4, %v821_v53 }
 0x754   : > { %v894_v58 = vpop.f32.mrf.mxu1 }
 0x755   : > { %899 = vrot.lane.b32.xlu1 %v894_v58, %s1662_s20 }
 0x756   : > { %v1412_v59 = vpop.f32.mrf.mxu1 }
 0x7c7   : > { %v900_v60 = vpop.permute.xlu1 %899 }
 0x7c8   : > { %v902_v61 = vsel %vm570_vm3, %v729_v40, %v900_v60 }
 0x7c9   : > { %1422 = vmatmul.mubr.msk.f32.vlgmr.msra.gmra.mxu0 %vm454_vm1, %v902_v61 }
 0x889   : > { %v983_v63 = vpop.f32.mrf.mxu0 }
 0x88a   : > { %v984_v1 = vadd.f32 %v1335_v62, %v983_v63 }
 0x88b   : > { %v1423_v2 = vpop.f32.mrf.mxu0 }
 0x88c   : > { %v987_v3 = vadd.f32 %v984_v1, %v1844_v20 }
 0x88e   : > { %v990_v4 = vsel %vm454_vm1, %v987_v3, 0.0 }
 0x88f   : > { %991 = vadd.xlane.f32.xlu1 %v990_v4 }
 0x918   : > { %v992_v5 = vpop.xlane.xlu1 %991 }
 0x919   : > { %v993_v6 = vmul.f32 0.03125, %v992_v5 }
 0x91b   : > { %v994_v7 = vsub.f32 %v987_v3, %v993_v6 }
 0x91d   : > { %v995_v8 = vmul.f32 %v994_v7, %v994_v7 }
 0x91f   : > { %v996_v9 = vsel %vm454_vm1, %v995_v8, 0.0 }
 0x920   : > { %997 = vadd.xlane.f32.xlu0 %v996_v9 }
 0x9a9   : > { %v998_v12 = vpop.xlane.xlu0 %997 }
 0x9aa   : > { %v999_v13 = vmul.f32 0.03125, %v998_v12 }
 0x9ac   : > { %v1000_v14 = vadd.f32 1e-05, %v999_v13 }
 0x9ae   : > { %1542 = vrsqrt.f32 %v1000_v14 }
 0x9bb   : > { %v1543_v15 = vpop.eup %1542 }
 0x9bc   : > { %v1002_v17 = vmul.f32 %v1543_v15, %v994_v7 }
 0x9be   : > { %v1009_v19 = vmul.f32 %v1337_v16, %v1002_v17 }
 0x9c0   : > { %v1901_v20 = vadd.f32 %v1338_v18, %v1009_v19 }
 0x9c2   : > { %1020 = vst.msk [vmem:[#allocation2 + $0x4] sm:$0xff] %vm454_vm1, %v1901_v20 }
 0x9c3 LB: >> { %v1663_v22 = vmov 0.0   ;;  %vm1664_vm5 = vmmov 0   ;;  %s1339_s23 = sadd.s32 4294967292, %s1650_s22  ;;  %s1341_s30 = sshll.u32 %s1650_s22, 5  ;;  %s1650_s22 = sphi %s1906_s22, %s1028_s22   ;;  %v1646_v21 = vphi %v1644_v21, %v1645_v21  }
 0x9c4   : >> { %1424 = vmatprep.subr.mxu0 %v1663_v22  ;;  %1432 = vmatprep.mubr.msk.f32.mxu0 %vm1664_vm5, %v1663_v22  ;;  %v1031_v23 = vstv %s1339_s23  ;;  %s1042_s24 = scalar_lea.vmem [#allocation3], %s1341_s30  ;;  %s1036_s15 = scalar_lea.vmem [#allocation2], %s1650_s22 }
 0x9c5   : >> { %v1046_v24 = vld [vmem:[%s1042_s24 + $0x18] sm:$0xff]  ;;  %v1045_v25 = vld [vmem:[%s1042_s24 + $0x10] sm:$0xff]  ;;  %v1032_v26 = vadd.s32 %v1031_v23, %v1022_v11  ;;  %v1044_v27 = vld [vmem:[%s1042_s24 + $0x8] sm:$0xff]  ;;  %s1028_s22 = sadd.s32 1, %s1650_s22  }
 0x9c6   : >> { %1425 = vmatpush3.msra.mxu0 %v1046_v24  ;;  %v1043_v29 = vld [vmem:[%s1042_s24] sm:$0xff]  ;;  %p1025_p8 = scmp.ge.s32.totalorder %s1028_s22, 9  }
 0x9c7   : >> { %1426 = vmatprep.subr.mxu0 %v1663_v22  ;;  %vm1033_vm6 = vcmp.ge.s32.totalorder %v1032_v26, 0  ;;  %vm1034_vm7 = vcmp.lt.s32.totalorder %v1032_v26, 8  ;;  %v1137_v35 = vld [vmem:[%s2010_s11 + $0x38] sm:$0xff] (%p1025_p8)  ;;  %v1136_v36 = vld [vmem:[%s2010_s11 + $0x30] sm:$0xff] (%p1025_p8)  ;;  %v1135_v37 = vld [vmem:[%s2010_s11 + $0x28] sm:$0xff] (%p1025_p8)  ;;  %vm1145_vm9 = vcmask (%p1025_p8), 523264  }
 0x9c8   : >> { %1427 = vmatpush3.msra.mxu0 %v1045_v25  ;;  %vm1035_vm8 = vmand %vm1033_vm6, %vm1034_vm7  ;;  %v1134_v38 = vld [vmem:[%s2010_s11 + $0x20] sm:$0xff] (%p1025_p8)  ;;  %v1133_v40 = vld [vmem:[%s2010_s11 + $0x18] sm:$0xff] (%p1025_p8)  ;;  %s1347_s20 = sshll.u32 (%p1025_p8), %s1757_s29, 7  ;;  %s2027_s2 = sand.u32 (%p1025_p8), 1, %s1634_s26  }
 0x9c9   : >> { %v1037_v28 = vld [vmem:[%s1036_s15] sm:$0xff]  ;;  %1428 = vmatprep.subr.mxu0 %v1663_v22  ;;  %v1340_v30 = vsel %vm1035_vm8, 1.0, %v1663_v22  ;;  %v1132_v41 = vld [vmem:[%s2010_s11 + $0x10] sm:$0xff] (%p1025_p8)  ;;  %v1131_v43 = vld [vmem:[%s2010_s11 + $0x8] sm:$0xff] (%p1025_p8)  ;;  %s2025_s15 = scalar_lea.vmem (%p1025_p8), [#allocation6], %s1822_s21  ;;  %s1233_s23 = scalar_lea.hbm (%p1025_p8), %s2012_s13, %s1347_s20 }
 0x9ca   : >> { %1429 = vmatpush3.msra.mxu0 %v1044_v27  ;;  %v1040_v31 = vmul.f32 %v1340_v30, %v1037_v28  ;;  %v1343_v39 = vld [vmem:[%s2009_s10] ss:$0 sm:$0xff] (%p1025_p8)  ;;  %s1235_s22 = sshll.u32 (%p1025_p8), %s2025_s15, 4  ;;  %s2026_s1 = smov (%p1025_p8), %s2025_s15  ;;  %s1236_s22 = int_to_ptr.vmem [resolvable:$true] %s1235_s22 }
 0x9cb   : >> { %1430 = vmatprep.subr.mxu0 %v1663_v22  ;;  %v1130_v44 = vld [vmem:[%s2010_s11] sm:$0xff] (%p1025_p8)  ;;  %s1222_s3 = scalar_lea.sflag (%p1025_p8), [#allocation5], %s2027_s2  ;;  %s1570_s30 = scalar_lea.vmem (%p1025_p8), %s1236_s22, 128 }
 0x9cc   : >> { %1431 = vmatpush3.msra.mxu0 %v1043_v29  ;;  %v1344_v46 = vld [vmem:[%s2011_s12] ss:$0 sm:$0xff] (%p1025_p8)  ;;  %p1571_p9 = scmp.ne.s32.totalorder (%p1025_p8), %s1236_s22, %s1570_s30  ;;  %s1665_s29 = smov (%p1025_p8), [#allocation6]  }
 0x9cd   : >> { %1433 = vmatmul.mubr.msk.f32.vlgmr.msra.gmra.mxu0 %vm454_vm1, %v1040_v31  ;;  %1435 = vmatprep.subr.mxu0 (%p1025_p8), %v1655_v0  ;;  %s1574_s24 = sshll.u32 (%p1025_p8), %s1665_s29, 4  ;;  %s1575_s24 = int_to_ptr.vmem [resolvable:$false] %s1574_s24 }
 0x9ce   : > { %1451 = vmatprep.mubr.msk.f32.mxu0 (%p1025_p8), %vm1656_vm2, %v1655_v0  ;;  %1436 = vmatpush3.msra.mxu0 (%p1025_p8), %v1137_v35  ;;  %p1572_p10 = pnand (%p1025_p8), %p1571_p9, %p1774_p5  ;;  %s1576_s15 = scalar_lea.vmem (%p1025_p8), %s1575_s24, 256 }
 0x9cf   : > { %1437 = vmatprep.subr.mxu0 (%p1025_p8), %v1655_v0  ;;  %p1577_p12 = scmp.lt.s32.totalorder (%p1025_p8), %s1236_s22, %s1575_s24  ;;  %p1578_p13 = scmp.lt.s32.totalorder (%p1025_p8), %s1576_s15, %s1570_s30 }
 0x9d0   : > { %1438 = vmatpush3.msra.mxu0 (%p1025_p8), %v1136_v36  ;;  %p1573_p11 = pneg (%p1025_p8), %p1572_p10 }
 0x9d1   : > { %1439 = vmatprep.subr.mxu0 (%p1025_p8), %v1655_v0  ;;  %p1579_p0 = por (%p1025_p8), %p1578_p13, %p1577_p12 }
 0x9d2   : > { %1440 = vmatpush3.msra.mxu0 (%p1025_p8), %v1135_v37 }
 0x9d3   : > { %1441 = vmatprep.subr.mxu0 (%p1025_p8), %v1655_v0  ;;  %p1580_p1 = pnand (%p1025_p8), %p1579_p0, %p1573_p11 }
 0x9d4   : > { %1442 = vmatpush3.msra.mxu0 (%p1025_p8), %v1134_v38 }
 0x9d5   : > { %1443 = vmatprep.subr.mxu0 (%p1025_p8), %v1655_v0 }
 0x9d6   : > { %1444 = vmatpush3.msra.mxu0 (%p1025_p8), %v1133_v40 }
 0x9d7   : > { %1445 = vmatprep.subr.mxu0 (%p1025_p8), %v1655_v0 }
 0x9d8   : > { %1446 = vmatpush3.msra.mxu0 (%p1025_p8), %v1132_v41 }
 0x9d9   : > { %1447 = vmatprep.subr.mxu0 (%p1025_p8), %v1655_v0 }
 0x9da   : > { %1448 = vmatpush3.msra.mxu0 (%p1025_p8), %v1131_v43 }
 0x9db   : > { %1449 = vmatprep.subr.mxu0 (%p1025_p8), %v1655_v0 }
 0x9dc   : > { %1450 = vmatpush3.msra.mxu0 (%p1025_p8), %v1130_v44 }
 0xa8c   : > { %1027 = sbr.rel (!%p1025_p8) target bundleno = 2499 (0x9c3), region = 121 }
 0xa8d   : >> { %v1116_v32 = vpop.f32.mrf.mxu0 }
 0xa8e   : >> { %v1120_v33 = vadd.f32 %v1646_v21, %v1116_v32  }
 0xa8f   : >> { %v1434_v34 = vpop.f32.mrf.mxu0 }
 0xa90   : >> { %v1645_v21 = vmov %v1120_v33   ;;  %v1128_v42 = vadd.f32 (%p1025_p8), %v1343_v39, %v1120_v33 }
 0xa92   : > { %v1129_v45 = vmax.f32 %v1128_v42, 0.0 }
 0xa94   : > { %1452 = vmatmul.mubr.msk.f32.vlgmr.msra.gmra.mxu0 %vm1145_vm9, %v1129_v45 }
 0xb54   : > { %v1215_v47 = vpop.f32.mrf.mxu0 }
 0xb55   : > { %v1216_v48 = vadd.f32 %v1344_v46, %v1215_v47 }
 0xb56   : > { %v1453_v49 = vpop.f32.mrf.mxu0 }
 0xb57   : > { %v1219_v50 = vadd.f32 %v1216_v48, %v1901_v20 }
 0xb59   : > { %1220 = vst.msk [vmem:[%s2026_s1] sm:$0xff] %vm454_vm1, %v1219_v50 }
 0xb5a   : > { %1583 = shalt.err (!%p1580_p1)
}
 0xb5b   : > { %s1584_s20 = scalar_lea.hbm %s1233_s23, 128  ;;  %s1588_s21 = scalar_lea.hbm %s2012_s13, 256 }
 0xb5c   : > { %p1585_p2 = scmp.ne.s32.totalorder %s1233_s23, %s1584_s20  ;;  %p1589_p7 = scmp.lt.s32.totalorder %s1233_s23, %s2012_s13 }
 0xb5d   : > { %p1590_p6 = scmp.lt.s32.totalorder %s1588_s21, %s1584_s20 }
 0xb5e   : > { %p1586_p3 = pnand %p1585_p2, %p1774_p5 }
 0xb5f   : > { %p1591_p8 = por %p1590_p6, %p1589_p7 }
 0xb60   : > { %p1587_p4 = pneg %p1586_p3 }
 0xb62   : > { %p1592_p9 = pnand %p1591_p8, %p1587_p4 }
 0xb64   : > { %1595 = shalt.err (!%p1592_p9)
}
 0xb65   : > { %1458 = dma.vmem_to_hbm [thread:$0]  (%p1774_p5), %s1236_s22, 128, %s1233_s23, %s1222_s3  }
 0xb66 PF: > { %p1470_p10 = scmp.ge.s32.totalorder %s1642_s28, 2  ;;  %s1247_s30 = sand.u32 1, %s1630_s25  }
 0xb67   : > { %p2028_p11 = scmp.ne.s32.totalorder %s2019_s19, 0  ;;  %s1248_s29 = scalar_lea.sflag [#allocation5], %s1247_s30 }
 0xb69   : > { %p1465_p12 = pnand %p1470_p10, %p2028_p11 }
 0xb6b   : > { %p1466_p13 = pneg %p1465_p12 }
 0xb6d   : > { %1625 = dma.done.wait (%p1466_p13), %s1248_s29, 128  }
 0xb6e   : > { %1627 = vsyncadd (%p1466_p13), %s1248_s29, 4294967168  ;;  %p24_p0 = scmp.ge.s32.totalorder %s1761_s14, 4   ;;  %s2029_s25 = smov %s1634_s26 }
 0xb6f   : > { %s2030_s26 = smov %s1638_s27  ;;  %s2031_s27 = smov %s1772_s17 }
 0xb70   : > { %s2032_s28 = smov %s1761_s14  ;;  %26 = sbr.rel (!%p24_p0) target bundleno = 9 (0x9), region = 132 }
 0xb75   :  { %1253 = vsyncpa [#allocation4], 1 }
 0xb76   :  { %1255 = vsyncpa [#allocation4 + $0x1], 1 }
 0xb77   :  { %1256 = vsyncpa [#allocation5], 1 }
 0xb78   :  { %1258 = vsyncpa [#allocation5 + $0x1], 1 }

</bundles_post_ra>
